<compile_context>
chip_gen: v7x
topology: tpu7x:2x2x1
jax: 0.10.0
libtpu: 0.0.40
codegen_flags: <defaults>
</compile_context>

<pallas_src>
import functools

import jax
import jax.numpy as jnp
from jax.experimental import pallas as pl
from jax.experimental.pallas import tpu as pltpu

LANE = 128  # vreg lane width; gate slabs are padded to a multiple of this.


def _round_up(n, m):
    return (n + m - 1) // m * m


def _lstm_kernel(gx_ref, whh_ref, b_ref, w1_ref, b1_ref, w2_ref, b2_ref,
                 out_ref, h_sc, c_sc, *, t_chunk, seq_len, hp, mask_tail):
    """One grid step = one (batch block, time chunk).

    gx_ref : (t_chunk, B_BLK, 4*Hp) f32   precomputed x @ W_ih^T (gate-padded)
    whh_ref: (Hp, 4*Hp)             bf16
    b_ref  : (1, 4*Hp)              f32   b_ih + b_hh (gate-padded)
    w1_ref : (Hp, H2)               bf16
    w2_ref : (H2, C)                bf16
    h_sc/c_sc: (B_BLK, Hp)          f32   recurrent state, persists over chunks
    """
    chunk = pl.program_id(1)

    @pl.when(chunk == 0)
    def _init():
        h_sc[...] = jnp.zeros_like(h_sc)
        c_sc[...] = jnp.zeros_like(c_sc)

    t0 = chunk * t_chunk

    def step(t_local, carry):
        h, c = carry
        # Only the recurrent projection sits on the serial chain:
        # (B_BLK, Hp) @ (Hp, 4Hp), bf16 MXU inputs, f32 accumulate.
        gates = (gx_ref[t_local]
                 + jnp.dot(h.astype(jnp.bfloat16), whh_ref[...],
                           preferred_element_type=jnp.float32)
                 + b_ref[...])
        # Lane-aligned gate slabs (PyTorch order i, f, g, o); hp % 128 == 0 so
        # each slice is a free vreg view.
        i_g = jax.nn.sigmoid(gates[:, 0 * hp:1 * hp])
        f_g = jax.nn.sigmoid(gates[:, 1 * hp:2 * hp])
        g_g = jnp.tanh(gates[:, 2 * hp:3 * hp])
        o_g = jax.nn.sigmoid(gates[:, 3 * hp:4 * hp])
        c_new = f_g * c + i_g * g_g
        h_new = o_g * jnp.tanh(c_new)
        if mask_tail:
            # Ignore zero-padded tail timesteps of the last chunk.
            keep = ((t0 + t_local) < seq_len).astype(jnp.float32)
            h_new = keep * h_new + (1.0 - keep) * h
            c_new = keep * c_new + (1.0 - keep) * c
        return h_new, c_new

    h, c = jax.lax.fori_loop(0, t_chunk, step, (h_sc[...], c_sc[...]),
                             unroll=True)
    h_sc[...] = h
    c_sc[...] = c

    # Classifier head only on the final time chunk (true last timestep's h).
    @pl.when(chunk == pl.num_programs(1) - 1)
    def _head():
        hid = (jnp.dot(h.astype(jnp.bfloat16), w1_ref[...],
                       preferred_element_type=jnp.float32) + b1_ref[...])
        hid = jnp.maximum(hid, 0.0)                      # ReLU
        # dropout -> identity (eval)
        out_ref[...] = (jnp.dot(hid.astype(jnp.bfloat16), w2_ref[...],
                                preferred_element_type=jnp.float32)
                        + b2_ref[...])


def prepare_params(params):
    """Fuse biases, pad gate/hidden dims to LANE multiples, pre-cast MXU weights to bf16."""
    w_ih, w_hh = params["w_ih"], params["w_hh"]          # (4H, F), (4H, H)
    b_lstm = params["b_ih"] + params["b_hh"]             # (4H,)
    w1, b1 = params["w1"], params["b1"]                  # (H2, H), (H2,)
    w2, b2 = params["w2"], params["b2"]                  # (C, H2), (C,)
    H = w_hh.shape[1]
    Hp = _round_up(H, LANE)
    H2 = w1.shape[0]
    C = w2.shape[0]

    def pad_gate_rows(w):                                # (4H, X) -> (4Hp, X)
        w4 = w.reshape(4, H, -1)
        w4 = jnp.pad(w4, ((0, 0), (0, Hp - H), (0, 0)))
        return w4.reshape(4 * Hp, -1)

    w_ih_p = pad_gate_rows(w_ih)                                   # (4Hp, F)
    w_hh_p = jnp.pad(pad_gate_rows(w_hh), ((0, 0), (0, Hp - H)))   # (4Hp, Hp)
    b_p = pad_gate_rows(b_lstm[:, None])[:, 0]                     # (4Hp,)
    w1_p = jnp.pad(w1, ((0, 0), (0, Hp - H)))                      # (H2, Hp)

    return {
        "Hp": Hp,
        "w_ih_t": w_ih_p.T,                              # (F, 4Hp) f32 (used in wrapper matmul)
        "w_hh_t": w_hh_p.T.astype(jnp.bfloat16),         # (Hp, 4Hp) bf16
        "b_lstm": b_p.reshape(1, 4 * Hp),                # (1, 4Hp) f32
        "w1_t": w1_p.T.astype(jnp.bfloat16),             # (Hp, H2) bf16
        "b1": b1.reshape(1, H2).astype(jnp.float32),
        "w2_t": w2.T.astype(jnp.bfloat16),               # (H2, C) bf16
        "b2": b2.reshape(1, C).astype(jnp.float32),
    }


def lstm_classifier_forward(x, prep, *, t_chunk=32, batch_block=None):
    """x: (B, T, F) batch_first float32. Returns logits (B, num_classes) f32."""
    B, T, _ = x.shape
    Hp = prep["Hp"]
    w_hh_t, b_lstm = prep["w_hh_t"], prep["b_lstm"]
    w1_t, b1, w2_t, b2 = prep["w1_t"], prep["b1"], prep["w2_t"], prep["b2"]
    C = w2_t.shape[1]

    # Hoisted, time-parallel input projection: one big (B*T, F) @ (F, 4Hp)
    # matmul; emitted time-major so there is no standalone transpose of x.
    gx = jnp.einsum("btf,fg->tbg", x, prep["w_ih_t"])    # (T, B, 4Hp) f32

    tc = max(1, min(t_chunk, T))
    t_pad = _round_up(T, tc)
    if t_pad != T:
        gx = jnp.pad(gx, ((0, t_pad - T), (0, 0), (0, 0)))
    n_chunks = t_pad // tc

    b_blk = B if batch_block is None else batch_block
    assert B % b_blk == 0, "batch_block must divide batch"
    n_bblk = B // b_blk

    kernel = functools.partial(_lstm_kernel, t_chunk=tc, seq_len=T, hp=Hp,
                               mask_tail=(t_pad != T))

    grid_spec = pltpu.PrefetchScalarGridSpec(
        num_scalar_prefetch=0,
        grid=(n_bblk, n_chunks),
        in_specs=[
            # Per-(batch block, time chunk) slab of precomputed x-gates.
            pl.BlockSpec((tc, b_blk, 4 * Hp), lambda b, c: (c, b, 0)),
            # Weights / biases: constant block index -> DMA'd once, stay resident.
            pl.BlockSpec(w_hh_t.shape, lambda b, c: (0, 0)),
            pl.BlockSpec(b_lstm.shape, lambda b, c: (0, 0)),
            pl.BlockSpec(w1_t.shape, lambda b, c: (0, 0)),
            pl.BlockSpec(b1.shape, lambda b, c: (0, 0)),
            pl.BlockSpec(w2_t.shape, lambda b, c: (0, 0)),
            pl.BlockSpec(b2.shape, lambda b, c: (0, 0)),
        ],
        out_specs=pl.BlockSpec((b_blk, C), lambda b, c: (b, 0)),
        scratch_shapes=[
            pltpu.VMEM((b_blk, Hp), jnp.float32),        # h state
            pltpu.VMEM((b_blk, Hp), jnp.float32),        # c state
        ],
    )

    return pl.pallas_call(
        kernel,
        out_shape=jax.ShapeDtypeStruct((B, C), jnp.float32),
        grid_spec=grid_spec,
        compiler_params=pltpu.CompilerParams(
            # batch blocks are independent (2 TCs on v7x); the time axis
            # carries the recurrence through VMEM scratch.
            dimension_semantics=("parallel", "arbitrary"),
            vmem_limit_bytes=32 * 1024 * 1024,
        ),
    )(gx, w_hh_t, b_lstm, w1_t, b1, w2_t, b2)


def init_params(key, feature_vector_size, hidden_size, num_classes):
    F, H, C = feature_vector_size, hidden_size, num_classes
    H2 = H // 2
    ks = jax.random.split(key, 8)
    scale = 0.1
    # PyTorch shapes: weight_ih (4H, F), weight_hh (4H, H), fc1 (H2, H), fc2 (C, H2)
    return {
        "w_ih": jax.random.normal(ks[0], (4 * H, F), jnp.float32) * scale,
        "w_hh": jax.random.normal(ks[1], (4 * H, H), jnp.float32) * scale,
        "b_ih": jax.random.normal(ks[2], (4 * H,), jnp.float32) * scale,
        "b_hh": jax.random.normal(ks[3], (4 * H,), jnp.float32) * scale,
        "w1": jax.random.normal(ks[4], (H2, H), jnp.float32) * scale,
        "b1": jax.random.normal(ks[5], (H2,), jnp.float32) * scale,
        "w2": jax.random.normal(ks[6], (C, H2), jnp.float32) * scale,
        "b2": jax.random.normal(ks[7], (C,), jnp.float32) * scale,
    }


def reference_forward(x, params):
    """Pure-JAX f32 reference matching PyTorch nn.LSTM (batch_first) + head."""
    B, T, _ = x.shape
    H = params["w_hh"].shape[1]
    w_ih_t = params["w_ih"].T
    w_hh_t = params["w_hh"].T
    b = params["b_ih"] + params["b_hh"]

    def step(carry, x_t):
        h, c = carry
        gates = x_t @ w_ih_t + h @ w_hh_t + b
        i = jax.nn.sigmoid(gates[:, 0 * H:1 * H])
        f = jax.nn.sigmoid(gates[:, 1 * H:2 * H])
        g = jnp.tanh(gates[:, 2 * H:3 * H])
        o = jax.nn.sigmoid(gates[:, 3 * H:4 * H])
        c_new = f * c + i * g
        h_new = o * jnp.tanh(c_new)
        return (h_new, c_new), None

    h0 = jnp.zeros((B, H), jnp.float32)
    c0 = jnp.zeros((B, H), jnp.float32)
    (h_last, _), _ = jax.lax.scan(step, (h0, c0), jnp.transpose(x, (1, 0, 2)))
    hid = jnp.maximum(h_last @ params["w1"].T + params["b1"], 0.0)
    return hid @ params["w2"].T + params["b2"]


if __name__ == "__main__":
    # Small, module-consistent shapes.
    batch = 2
    seq = 8                    # num_feature_vectors (sequence length)
    feature_vector_size = 16
    hidden_size = 32
    num_classes = 4

    key = jax.random.PRNGKey(0)
    k_x, k_p = jax.random.split(key)
    x = jax.random.normal(k_x, (batch, seq, feature_vector_size), jnp.float32)
    params = init_params(k_p, feature_vector_size, hidden_size, num_classes)
    prep = prepare_params(params)

    out = lstm_classifier_forward(x, prep)
    out = jax.block_until_ready(out)

    ref = reference_forward(x, params)
    assert out.shape == (batch, num_classes)
    # bf16 MXU operands with f32 accumulation -> loosened tolerance vs f32 ref.
    max_err = float(jnp.max(jnp.abs(out - ref)))
    assert jnp.allclose(out, ref, atol=3e-2, rtol=3e-2), (out, ref, max_err)
    print("KERNEL_OK")
</pallas_src>

<mosaic_0001>
module attributes {stable_mosaic.version = 11 : i64} {
  func.func @_lstm_kernel(%arg0: i32, %arg1: i32, %arg2: memref<8x2x512xf32, #tpu.memory_space<vmem>>, %arg3: memref<128x512xbf16, #tpu.memory_space<vmem>>, %arg4: memref<1x512xf32, #tpu.memory_space<vmem>>, %arg5: memref<128x16xbf16, #tpu.memory_space<vmem>>, %arg6: memref<1x16xf32, #tpu.memory_space<vmem>>, %arg7: memref<16x4xbf16, #tpu.memory_space<vmem>>, %arg8: memref<1x4xf32, #tpu.memory_space<vmem>>, %arg9: memref<2x4xf32, #tpu.memory_space<vmem>>, %arg10: memref<2x128xf32, #tpu.memory_space<vmem>>, %arg11: memref<2x128xf32, #tpu.memory_space<vmem>>) attributes {dimension_semantics = [#tpu.dimension_semantics<parallel>, #tpu.dimension_semantics<arbitrary>], iteration_bounds = array<i64: 1, 1>, scalar_prefetch = 0 : i64, scratch_operands = 2 : i64, tpu.core_type = #tpu.core_type<tc>, window_params = [{transform_indices = @transform_0, window_bounds = array<i64: 8, 2, 512>}, {pipeline_mode = #tpu.pipeline_mode<synchronous>, transform_indices = @transform_1, window_bounds = array<i64: 128, 512>}, {pipeline_mode = #tpu.pipeline_mode<synchronous>, transform_indices = @transform_2, window_bounds = array<i64: 1, 512>}, {pipeline_mode = #tpu.pipeline_mode<synchronous>, transform_indices = @transform_3, window_bounds = array<i64: 128, 16>}, {pipeline_mode = #tpu.pipeline_mode<synchronous>, transform_indices = @transform_4, window_bounds = array<i64: 1, 16>}, {pipeline_mode = #tpu.pipeline_mode<synchronous>, transform_indices = @transform_5, window_bounds = array<i64: 16, 4>}, {pipeline_mode = #tpu.pipeline_mode<synchronous>, transform_indices = @transform_6, window_bounds = array<i64: 1, 4>}, {transform_indices = @transform_7, window_bounds = array<i64: 2, 4>}]} {
    %c0_i32 = arith.constant 0 : i32
    %0 = arith.cmpi eq, %arg1, %c0_i32 : i32
    %1 = arith.extui %0 : i1 to i32
    %c0_i32_0 = arith.constant 0 : i32
    %2 = arith.cmpi ne, %1, %c0_i32_0 : i32
    scf.if %2 {
      %cst_90 = arith.constant 0.000000e+00 : f32
      %290 = vector.broadcast %cst_90 : f32 to vector<2x128xf32>
      %c0_91 = arith.constant 0 : index
      %c0_92 = arith.constant 0 : index
      %291 = vector.load %arg10[%c0_91, %c0_92] : memref<2x128xf32, #tpu.memory_space<vmem>>, vector<2x128xf32>
      tpu.vector_store %arg10[%c0_91, %c0_92], %290 {strides = array<i32>} : memref<2x128xf32, #tpu.memory_space<vmem>>, vector<2x128xf32>,
      %cst_93 = arith.constant 0.000000e+00 : f32
      %292 = vector.broadcast %cst_93 : f32 to vector<2x128xf32>
      %c0_94 = arith.constant 0 : index
      %c0_95 = arith.constant 0 : index
      %293 = vector.load %arg11[%c0_94, %c0_95] : memref<2x128xf32, #tpu.memory_space<vmem>>, vector<2x128xf32>
      tpu.vector_store %arg11[%c0_94, %c0_95], %292 {strides = array<i32>} : memref<2x128xf32, #tpu.memory_space<vmem>>, vector<2x128xf32>,
    } else {
    }
    %c0 = arith.constant 0 : index
    %c0_1 = arith.constant 0 : index
    %3 = vector.load %arg10[%c0, %c0_1] : memref<2x128xf32, #tpu.memory_space<vmem>>, vector<2x128xf32>
    %c0_2 = arith.constant 0 : index
    %c0_3 = arith.constant 0 : index
    %4 = vector.load %arg11[%c0_2, %c0_3] : memref<2x128xf32, #tpu.memory_space<vmem>>, vector<2x128xf32>
    %c0_i32_4 = arith.constant 0 : i32
    %5 = arith.index_cast %c0_i32_4 : i32 to index
    %c0_5 = arith.constant 0 : index
    %c0_6 = arith.constant 0 : index
    %6 = vector.load %arg2[%5, %c0_5, %c0_6] : memref<8x2x512xf32, #tpu.memory_space<vmem>>, vector<1x2x512xf32>
    %7 = vector.shape_cast %6 : vector<1x2x512xf32> to vector<2x512xf32>
    %8 = arith.truncf %3 : vector<2x128xf32> to vector<2x128xbf16>
    %c0_7 = arith.constant 0 : index
    %c0_8 = arith.constant 0 : index
    %9 = vector.load %arg3[%c0_7, %c0_8] : memref<128x512xbf16, #tpu.memory_space<vmem>>, vector<128x512xbf16>
    %cst = arith.constant dense<0.000000e+00> : vector<2x512xf32>
    %10 = tpu.matmul %8, %9, %cst {dimension_numbers = #tpu.dot_dimension_numbers<[1], [0], [0], [1], [0, 0, 1, 1], [], []>} : vector<2x128xbf16>, vector<128x512xbf16>, vector<2x512xf32> -> vector<2x512xf32>
    %11 = arith.addf %7, %10 : vector<2x512xf32>
    %c0_9 = arith.constant 0 : index
    %c0_10 = arith.constant 0 : index
    %12 = vector.load %arg4[%c0_9, %c0_10] : memref<1x512xf32, #tpu.memory_space<vmem>>, vector<1x512xf32>
    %13 = vector.broadcast %12 : vector<1x512xf32> to vector<2x512xf32>
    %14 = arith.addf %11, %13 : vector<2x512xf32>
    %15 = vector.extract_strided_slice %14 {offsets = [0, 0], sizes = [2, 128], strides = [1, 1]} : vector<2x512xf32> to vector<2x128xf32>
    %16 = arith.negf %15 : vector<2x128xf32>
    %17 = math.exp %16 : vector<2x128xf32>
    %cst_11 = arith.constant 1.000000e+00 : f32
    %18 = vector.broadcast %cst_11 : f32 to vector<2x128xf32>
    %19 = arith.addf %18, %17 : vector<2x128xf32>
    %20 = arith.divf %18, %19 : vector<2x128xf32>
    %21 = vector.extract_strided_slice %14 {offsets = [0, 128], sizes = [2, 128], strides = [1, 1]} : vector<2x512xf32> to vector<2x128xf32>
    %22 = arith.negf %21 : vector<2x128xf32>
    %23 = math.exp %22 : vector<2x128xf32>
    %cst_12 = arith.constant 1.000000e+00 : f32
    %24 = vector.broadcast %cst_12 : f32 to vector<2x128xf32>
    %25 = arith.addf %24, %23 : vector<2x128xf32>
    %26 = arith.divf %24, %25 : vector<2x128xf32>
    %27 = vector.extract_strided_slice %14 {offsets = [0, 256], sizes = [2, 128], strides = [1, 1]} : vector<2x512xf32> to vector<2x128xf32>
    %28 = math.tanh %27 : vector<2x128xf32>
    %29 = vector.extract_strided_slice %14 {offsets = [0, 384], sizes = [2, 128], strides = [1, 1]} : vector<2x512xf32> to vector<2x128xf32>
    %30 = arith.negf %29 : vector<2x128xf32>
    %31 = math.exp %30 : vector<2x128xf32>
    %cst_13 = arith.constant 1.000000e+00 : f32
    %32 = vector.broadcast %cst_13 : f32 to vector<2x128xf32>
    %33 = arith.addf %32, %31 : vector<2x128xf32>
    %34 = arith.divf %32, %33 : vector<2x128xf32>
    %35 = arith.mulf %26, %4 : vector<2x128xf32>
    %36 = arith.mulf %20, %28 : vector<2x128xf32>
    %37 = arith.addf %35, %36 : vector<2x128xf32>
    %38 = math.tanh %37 : vector<2x128xf32>
    %39 = arith.mulf %34, %38 : vector<2x128xf32>
    %c1_i32 = arith.constant 1 : i32
    %40 = arith.index_cast %c1_i32 : i32 to index
    %c0_14 = arith.constant 0 : index
    %c0_15 = arith.constant 0 : index
    %41 = vector.load %arg2[%40, %c0_14, %c0_15] : memref<8x2x512xf32, #tpu.memory_space<vmem>>, vector<1x2x512xf32>
    %42 = vector.shape_cast %41 : vector<1x2x512xf32> to vector<2x512xf32>
    %43 = arith.truncf %39 : vector<2x128xf32> to vector<2x128xbf16>
    %c0_16 = arith.constant 0 : index
    %c0_17 = arith.constant 0 : index
    %44 = vector.load %arg3[%c0_16, %c0_17] : memref<128x512xbf16, #tpu.memory_space<vmem>>, vector<128x512xbf16>
    %cst_18 = arith.constant dense<0.000000e+00> : vector<2x512xf32>
    %45 = tpu.matmul %43, %44, %cst_18 {dimension_numbers = #tpu.dot_dimension_numbers<[1], [0], [0], [1], [0, 0, 1, 1], [], []>} : vector<2x128xbf16>, vector<128x512xbf16>, vector<2x512xf32> -> vector<2x512xf32>
    %46 = arith.addf %42, %45 : vector<2x512xf32>
    %c0_19 = arith.constant 0 : index
    %c0_20 = arith.constant 0 : index
    %47 = vector.load %arg4[%c0_19, %c0_20] : memref<1x512xf32, #tpu.memory_space<vmem>>, vector<1x512xf32>
    %48 = vector.broadcast %47 : vector<1x512xf32> to vector<2x512xf32>
    %49 = arith.addf %46, %48 : vector<2x512xf32>
    %50 = vector.extract_strided_slice %49 {offsets = [0, 0], sizes = [2, 128], strides = [1, 1]} : vector<2x512xf32> to vector<2x128xf32>
    %51 = arith.negf %50 : vector<2x128xf32>
    %52 = math.exp %51 : vector<2x128xf32>
    %cst_21 = arith.constant 1.000000e+00 : f32
    %53 = vector.broadcast %cst_21 : f32 to vector<2x128xf32>
    %54 = arith.addf %53, %52 : vector<2x128xf32>
    %55 = arith.divf %53, %54 : vector<2x128xf32>
    %56 = vector.extract_strided_slice %49 {offsets = [0, 128], sizes = [2, 128], strides = [1, 1]} : vector<2x512xf32> to vector<2x128xf32>
    %57 = arith.negf %56 : vector<2x128xf32>
    %58 = math.exp %57 : vector<2x128xf32>
    %cst_22 = arith.constant 1.000000e+00 : f32
    %59 = vector.broadcast %cst_22 : f32 to vector<2x128xf32>
    %60 = arith.addf %59, %58 : vector<2x128xf32>
    %61 = arith.divf %59, %60 : vector<2x128xf32>
    %62 = vector.extract_strided_slice %49 {offsets = [0, 256], sizes = [2, 128], strides = [1, 1]} : vector<2x512xf32> to vector<2x128xf32>
    %63 = math.tanh %62 : vector<2x128xf32>
    %64 = vector.extract_strided_slice %49 {offsets = [0, 384], sizes = [2, 128], strides = [1, 1]} : vector<2x512xf32> to vector<2x128xf32>
    %65 = arith.negf %64 : vector<2x128xf32>
    %66 = math.exp %65 : vector<2x128xf32>
    %cst_23 = arith.constant 1.000000e+00 : f32
    %67 = vector.broadcast %cst_23 : f32 to vector<2x128xf32>
    %68 = arith.addf %67, %66 : vector<2x128xf32>
    %69 = arith.divf %67, %68 : vector<2x128xf32>
    %70 = arith.mulf %61, %37 : vector<2x128xf32>
    %71 = arith.mulf %55, %63 : vector<2x128xf32>
    %72 = arith.addf %70, %71 : vector<2x128xf32>
    %73 = math.tanh %72 : vector<2x128xf32>
    %74 = arith.mulf %69, %73 : vector<2x128xf32>
    %c2_i32 = arith.constant 2 : i32
    %75 = arith.index_cast %c2_i32 : i32 to index
    %c0_24 = arith.constant 0 : index
    %c0_25 = arith.constant 0 : index
    %76 = vector.load %arg2[%75, %c0_24, %c0_25] : memref<8x2x512xf32, #tpu.memory_space<vmem>>, vector<1x2x512xf32>
    %77 = vector.shape_cast %76 : vector<1x2x512xf32> to vector<2x512xf32>
    %78 = arith.truncf %74 : vector<2x128xf32> to vector<2x128xbf16>
    %c0_26 = arith.constant 0 : index
    %c0_27 = arith.constant 0 : index
    %79 = vector.load %arg3[%c0_26, %c0_27] : memref<128x512xbf16, #tpu.memory_space<vmem>>, vector<128x512xbf16>
    %cst_28 = arith.constant dense<0.000000e+00> : vector<2x512xf32>
    %80 = tpu.matmul %78, %79, %cst_28 {dimension_numbers = #tpu.dot_dimension_numbers<[1], [0], [0], [1], [0, 0, 1, 1], [], []>} : vector<2x128xbf16>, vector<128x512xbf16>, vector<2x512xf32> -> vector<2x512xf32>
    %81 = arith.addf %77, %80 : vector<2x512xf32>
    %c0_29 = arith.constant 0 : index
    %c0_30 = arith.constant 0 : index
    %82 = vector.load %arg4[%c0_29, %c0_30] : memref<1x512xf32, #tpu.memory_space<vmem>>, vector<1x512xf32>
    %83 = vector.broadcast %82 : vector<1x512xf32> to vector<2x512xf32>
    %84 = arith.addf %81, %83 : vector<2x512xf32>
    %85 = vector.extract_strided_slice %84 {offsets = [0, 0], sizes = [2, 128], strides = [1, 1]} : vector<2x512xf32> to vector<2x128xf32>
    %86 = arith.negf %85 : vector<2x128xf32>
    %87 = math.exp %86 : vector<2x128xf32>
    %cst_31 = arith.constant 1.000000e+00 : f32
    %88 = vector.broadcast %cst_31 : f32 to vector<2x128xf32>
    %89 = arith.addf %88, %87 : vector<2x128xf32>
    %90 = arith.divf %88, %89 : vector<2x128xf32>
    %91 = vector.extract_strided_slice %84 {offsets = [0, 128], sizes = [2, 128], strides = [1, 1]} : vector<2x512xf32> to vector<2x128xf32>
    %92 = arith.negf %91 : vector<2x128xf32>
    %93 = math.exp %92 : vector<2x128xf32>
    %cst_32 = arith.constant 1.000000e+00 : f32
    %94 = vector.broadcast %cst_32 : f32 to vector<2x128xf32>
    %95 = arith.addf %94, %93 : vector<2x128xf32>
    %96 = arith.divf %94, %95 : vector<2x128xf32>
    %97 = vector.extract_strided_slice %84 {offsets = [0, 256], sizes = [2, 128], strides = [1, 1]} : vector<2x512xf32> to vector<2x128xf32>
    %98 = math.tanh %97 : vector<2x128xf32>
    %99 = vector.extract_strided_slice %84 {offsets = [0, 384], sizes = [2, 128], strides = [1, 1]} : vector<2x512xf32> to vector<2x128xf32>
    %100 = arith.negf %99 : vector<2x128xf32>
    %101 = math.exp %100 : vector<2x128xf32>
    %cst_33 = arith.constant 1.000000e+00 : f32
    %102 = vector.broadcast %cst_33 : f32 to vector<2x128xf32>
    %103 = arith.addf %102, %101 : vector<2x128xf32>
    %104 = arith.divf %102, %103 : vector<2x128xf32>
    %105 = arith.mulf %96, %72 : vector<2x128xf32>
    %106 = arith.mulf %90, %98 : vector<2x128xf32>
    %107 = arith.addf %105, %106 : vector<2x128xf32>
    %108 = math.tanh %107 : vector<2x128xf32>
    %109 = arith.mulf %104, %108 : vector<2x128xf32>
    %c3_i32 = arith.constant 3 : i32
    %110 = arith.index_cast %c3_i32 : i32 to index
    %c0_34 = arith.constant 0 : index
    %c0_35 = arith.constant 0 : index
    %111 = vector.load %arg2[%110, %c0_34, %c0_35] : memref<8x2x512xf32, #tpu.memory_space<vmem>>, vector<1x2x512xf32>
    %112 = vector.shape_cast %111 : vector<1x2x512xf32> to vector<2x512xf32>
    %113 = arith.truncf %109 : vector<2x128xf32> to vector<2x128xbf16>
    %c0_36 = arith.constant 0 : index
    %c0_37 = arith.constant 0 : index
    %114 = vector.load %arg3[%c0_36, %c0_37] : memref<128x512xbf16, #tpu.memory_space<vmem>>, vector<128x512xbf16>
    %cst_38 = arith.constant dense<0.000000e+00> : vector<2x512xf32>
    %115 = tpu.matmul %113, %114, %cst_38 {dimension_numbers = #tpu.dot_dimension_numbers<[1], [0], [0], [1], [0, 0, 1, 1], [], []>} : vector<2x128xbf16>, vector<128x512xbf16>, vector<2x512xf32> -> vector<2x512xf32>
    %116 = arith.addf %112, %115 : vector<2x512xf32>
    %c0_39 = arith.constant 0 : index
    %c0_40 = arith.constant 0 : index
    %117 = vector.load %arg4[%c0_39, %c0_40] : memref<1x512xf32, #tpu.memory_space<vmem>>, vector<1x512xf32>
    %118 = vector.broadcast %117 : vector<1x512xf32> to vector<2x512xf32>
    %119 = arith.addf %116, %118 : vector<2x512xf32>
    %120 = vector.extract_strided_slice %119 {offsets = [0, 0], sizes = [2, 128], strides = [1, 1]} : vector<2x512xf32> to vector<2x128xf32>
    %121 = arith.negf %120 : vector<2x128xf32>
    %122 = math.exp %121 : vector<2x128xf32>
    %cst_41 = arith.constant 1.000000e+00 : f32
    %123 = vector.broadcast %cst_41 : f32 to vector<2x128xf32>
    %124 = arith.addf %123, %122 : vector<2x128xf32>
    %125 = arith.divf %123, %124 : vector<2x128xf32>
    %126 = vector.extract_strided_slice %119 {offsets = [0, 128], sizes = [2, 128], strides = [1, 1]} : vector<2x512xf32> to vector<2x128xf32>
    %127 = arith.negf %126 : vector<2x128xf32>
    %128 = math.exp %127 : vector<2x128xf32>
    %cst_42 = arith.constant 1.000000e+00 : f32
    %129 = vector.broadcast %cst_42 : f32 to vector<2x128xf32>
    %130 = arith.addf %129, %128 : vector<2x128xf32>
    %131 = arith.divf %129, %130 : vector<2x128xf32>
    %132 = vector.extract_strided_slice %119 {offsets = [0, 256], sizes = [2, 128], strides = [1, 1]} : vector<2x512xf32> to vector<2x128xf32>
    %133 = math.tanh %132 : vector<2x128xf32>
    %134 = vector.extract_strided_slice %119 {offsets = [0, 384], sizes = [2, 128], strides = [1, 1]} : vector<2x512xf32> to vector<2x128xf32>
    %135 = arith.negf %134 : vector<2x128xf32>
    %136 = math.exp %135 : vector<2x128xf32>
    %cst_43 = arith.constant 1.000000e+00 : f32
    %137 = vector.broadcast %cst_43 : f32 to vector<2x128xf32>
    %138 = arith.addf %137, %136 : vector<2x128xf32>
    %139 = arith.divf %137, %138 : vector<2x128xf32>
    %140 = arith.mulf %131, %107 : vector<2x128xf32>
    %141 = arith.mulf %125, %133 : vector<2x128xf32>
    %142 = arith.addf %140, %141 : vector<2x128xf32>
    %143 = math.tanh %142 : vector<2x128xf32>
    %144 = arith.mulf %139, %143 : vector<2x128xf32>
    %c4_i32 = arith.constant 4 : i32
    %145 = arith.index_cast %c4_i32 : i32 to index
    %c0_44 = arith.constant 0 : index
    %c0_45 = arith.constant 0 : index
    %146 = vector.load %arg2[%145, %c0_44, %c0_45] : memref<8x2x512xf32, #tpu.memory_space<vmem>>, vector<1x2x512xf32>
    %147 = vector.shape_cast %146 : vector<1x2x512xf32> to vector<2x512xf32>
    %148 = arith.truncf %144 : vector<2x128xf32> to vector<2x128xbf16>
    %c0_46 = arith.constant 0 : index
    %c0_47 = arith.constant 0 : index
    %149 = vector.load %arg3[%c0_46, %c0_47] : memref<128x512xbf16, #tpu.memory_space<vmem>>, vector<128x512xbf16>
    %cst_48 = arith.constant dense<0.000000e+00> : vector<2x512xf32>
    %150 = tpu.matmul %148, %149, %cst_48 {dimension_numbers = #tpu.dot_dimension_numbers<[1], [0], [0], [1], [0, 0, 1, 1], [], []>} : vector<2x128xbf16>, vector<128x512xbf16>, vector<2x512xf32> -> vector<2x512xf32>
    %151 = arith.addf %147, %150 : vector<2x512xf32>
    %c0_49 = arith.constant 0 : index
    %c0_50 = arith.constant 0 : index
    %152 = vector.load %arg4[%c0_49, %c0_50] : memref<1x512xf32, #tpu.memory_space<vmem>>, vector<1x512xf32>
    %153 = vector.broadcast %152 : vector<1x512xf32> to vector<2x512xf32>
    %154 = arith.addf %151, %153 : vector<2x512xf32>
    %155 = vector.extract_strided_slice %154 {offsets = [0, 0], sizes = [2, 128], strides = [1, 1]} : vector<2x512xf32> to vector<2x128xf32>
    %156 = arith.negf %155 : vector<2x128xf32>
    %157 = math.exp %156 : vector<2x128xf32>
    %cst_51 = arith.constant 1.000000e+00 : f32
    %158 = vector.broadcast %cst_51 : f32 to vector<2x128xf32>
    %159 = arith.addf %158, %157 : vector<2x128xf32>
    %160 = arith.divf %158, %159 : vector<2x128xf32>
    %161 = vector.extract_strided_slice %154 {offsets = [0, 128], sizes = [2, 128], strides = [1, 1]} : vector<2x512xf32> to vector<2x128xf32>
    %162 = arith.negf %161 : vector<2x128xf32>
    %163 = math.exp %162 : vector<2x128xf32>
    %cst_52 = arith.constant 1.000000e+00 : f32
    %164 = vector.broadcast %cst_52 : f32 to vector<2x128xf32>
    %165 = arith.addf %164, %163 : vector<2x128xf32>
    %166 = arith.divf %164, %165 : vector<2x128xf32>
    %167 = vector.extract_strided_slice %154 {offsets = [0, 256], sizes = [2, 128], strides = [1, 1]} : vector<2x512xf32> to vector<2x128xf32>
    %168 = math.tanh %167 : vector<2x128xf32>
    %169 = vector.extract_strided_slice %154 {offsets = [0, 384], sizes = [2, 128], strides = [1, 1]} : vector<2x512xf32> to vector<2x128xf32>
    %170 = arith.negf %169 : vector<2x128xf32>
    %171 = math.exp %170 : vector<2x128xf32>
    %cst_53 = arith.constant 1.000000e+00 : f32
    %172 = vector.broadcast %cst_53 : f32 to vector<2x128xf32>
    %173 = arith.addf %172, %171 : vector<2x128xf32>
    %174 = arith.divf %172, %173 : vector<2x128xf32>
    %175 = arith.mulf %166, %142 : vector<2x128xf32>
    %176 = arith.mulf %160, %168 : vector<2x128xf32>
    %177 = arith.addf %175, %176 : vector<2x128xf32>
    %178 = math.tanh %177 : vector<2x128xf32>
    %179 = arith.mulf %174, %178 : vector<2x128xf32>
    %c5_i32 = arith.constant 5 : i32
    %180 = arith.index_cast %c5_i32 : i32 to index
    %c0_54 = arith.constant 0 : index
    %c0_55 = arith.constant 0 : index
    %181 = vector.load %arg2[%180, %c0_54, %c0_55] : memref<8x2x512xf32, #tpu.memory_space<vmem>>, vector<1x2x512xf32>
    %182 = vector.shape_cast %181 : vector<1x2x512xf32> to vector<2x512xf32>
    %183 = arith.truncf %179 : vector<2x128xf32> to vector<2x128xbf16>
    %c0_56 = arith.constant 0 : index
    %c0_57 = arith.constant 0 : index
    %184 = vector.load %arg3[%c0_56, %c0_57] : memref<128x512xbf16, #tpu.memory_space<vmem>>, vector<128x512xbf16>
    %cst_58 = arith.constant dense<0.000000e+00> : vector<2x512xf32>
    %185 = tpu.matmul %183, %184, %cst_58 {dimension_numbers = #tpu.dot_dimension_numbers<[1], [0], [0], [1], [0, 0, 1, 1], [], []>} : vector<2x128xbf16>, vector<128x512xbf16>, vector<2x512xf32> -> vector<2x512xf32>
    %186 = arith.addf %182, %185 : vector<2x512xf32>
    %c0_59 = arith.constant 0 : index
    %c0_60 = arith.constant 0 : index
    %187 = vector.load %arg4[%c0_59, %c0_60] : memref<1x512xf32, #tpu.memory_space<vmem>>, vector<1x512xf32>
    %188 = vector.broadcast %187 : vector<1x512xf32> to vector<2x512xf32>
    %189 = arith.addf %186, %188 : vector<2x512xf32>
    %190 = vector.extract_strided_slice %189 {offsets = [0, 0], sizes = [2, 128], strides = [1, 1]} : vector<2x512xf32> to vector<2x128xf32>
    %191 = arith.negf %190 : vector<2x128xf32>
    %192 = math.exp %191 : vector<2x128xf32>
    %cst_61 = arith.constant 1.000000e+00 : f32
    %193 = vector.broadcast %cst_61 : f32 to vector<2x128xf32>
    %194 = arith.addf %193, %192 : vector<2x128xf32>
    %195 = arith.divf %193, %194 : vector<2x128xf32>
    %196 = vector.extract_strided_slice %189 {offsets = [0, 128], sizes = [2, 128], strides = [1, 1]} : vector<2x512xf32> to vector<2x128xf32>
    %197 = arith.negf %196 : vector<2x128xf32>
    %198 = math.exp %197 : vector<2x128xf32>
    %cst_62 = arith.constant 1.000000e+00 : f32
    %199 = vector.broadcast %cst_62 : f32 to vector<2x128xf32>
    %200 = arith.addf %199, %198 : vector<2x128xf32>
    %201 = arith.divf %199, %200 : vector<2x128xf32>
    %202 = vector.extract_strided_slice %189 {offsets = [0, 256], sizes = [2, 128], strides = [1, 1]} : vector<2x512xf32> to vector<2x128xf32>
    %203 = math.tanh %202 : vector<2x128xf32>
    %204 = vector.extract_strided_slice %189 {offsets = [0, 384], sizes = [2, 128], strides = [1, 1]} : vector<2x512xf32> to vector<2x128xf32>
    %205 = arith.negf %204 : vector<2x128xf32>
    %206 = math.exp %205 : vector<2x128xf32>
    %cst_63 = arith.constant 1.000000e+00 : f32
    %207 = vector.broadcast %cst_63 : f32 to vector<2x128xf32>
    %208 = arith.addf %207, %206 : vector<2x128xf32>
    %209 = arith.divf %207, %208 : vector<2x128xf32>
    %210 = arith.mulf %201, %177 : vector<2x128xf32>
    %211 = arith.mulf %195, %203 : vector<2x128xf32>
    %212 = arith.addf %210, %211 : vector<2x128xf32>
    %213 = math.tanh %212 : vector<2x128xf32>
    %214 = arith.mulf %209, %213 : vector<2x128xf32>
    %c6_i32 = arith.constant 6 : i32
    %215 = arith.index_cast %c6_i32 : i32 to index
    %c0_64 = arith.constant 0 : index
    %c0_65 = arith.constant 0 : index
    %216 = vector.load %arg2[%215, %c0_64, %c0_65] : memref<8x2x512xf32, #tpu.memory_space<vmem>>, vector<1x2x512xf32>
    %217 = vector.shape_cast %216 : vector<1x2x512xf32> to vector<2x512xf32>
    %218 = arith.truncf %214 : vector<2x128xf32> to vector<2x128xbf16>
    %c0_66 = arith.constant 0 : index
    %c0_67 = arith.constant 0 : index
    %219 = vector.load %arg3[%c0_66, %c0_67] : memref<128x512xbf16, #tpu.memory_space<vmem>>, vector<128x512xbf16>
    %cst_68 = arith.constant dense<0.000000e+00> : vector<2x512xf32>
    %220 = tpu.matmul %218, %219, %cst_68 {dimension_numbers = #tpu.dot_dimension_numbers<[1], [0], [0], [1], [0, 0, 1, 1], [], []>} : vector<2x128xbf16>, vector<128x512xbf16>, vector<2x512xf32> -> vector<2x512xf32>
    %221 = arith.addf %217, %220 : vector<2x512xf32>
    %c0_69 = arith.constant 0 : index
    %c0_70 = arith.constant 0 : index
    %222 = vector.load %arg4[%c0_69, %c0_70] : memref<1x512xf32, #tpu.memory_space<vmem>>, vector<1x512xf32>
    %223 = vector.broadcast %222 : vector<1x512xf32> to vector<2x512xf32>
    %224 = arith.addf %221, %223 : vector<2x512xf32>
    %225 = vector.extract_strided_slice %224 {offsets = [0, 0], sizes = [2, 128], strides = [1, 1]} : vector<2x512xf32> to vector<2x128xf32>
    %226 = arith.negf %225 : vector<2x128xf32>
    %227 = math.exp %226 : vector<2x128xf32>
    %cst_71 = arith.constant 1.000000e+00 : f32
    %228 = vector.broadcast %cst_71 : f32 to vector<2x128xf32>
    %229 = arith.addf %228, %227 : vector<2x128xf32>
    %230 = arith.divf %228, %229 : vector<2x128xf32>
    %231 = vector.extract_strided_slice %224 {offsets = [0, 128], sizes = [2, 128], strides = [1, 1]} : vector<2x512xf32> to vector<2x128xf32>
    %232 = arith.negf %231 : vector<2x128xf32>
    %233 = math.exp %232 : vector<2x128xf32>
    %cst_72 = arith.constant 1.000000e+00 : f32
    %234 = vector.broadcast %cst_72 : f32 to vector<2x128xf32>
    %235 = arith.addf %234, %233 : vector<2x128xf32>
    %236 = arith.divf %234, %235 : vector<2x128xf32>
    %237 = vector.extract_strided_slice %224 {offsets = [0, 256], sizes = [2, 128], strides = [1, 1]} : vector<2x512xf32> to vector<2x128xf32>
    %238 = math.tanh %237 : vector<2x128xf32>
    %239 = vector.extract_strided_slice %224 {offsets = [0, 384], sizes = [2, 128], strides = [1, 1]} : vector<2x512xf32> to vector<2x128xf32>
    %240 = arith.negf %239 : vector<2x128xf32>
    %241 = math.exp %240 : vector<2x128xf32>
    %cst_73 = arith.constant 1.000000e+00 : f32
    %242 = vector.broadcast %cst_73 : f32 to vector<2x128xf32>
    %243 = arith.addf %242, %241 : vector<2x128xf32>
    %244 = arith.divf %242, %243 : vector<2x128xf32>
    %245 = arith.mulf %236, %212 : vector<2x128xf32>
    %246 = arith.mulf %230, %238 : vector<2x128xf32>
    %247 = arith.addf %245, %246 : vector<2x128xf32>
    %248 = math.tanh %247 : vector<2x128xf32>
    %249 = arith.mulf %244, %248 : vector<2x128xf32>
    %c7_i32 = arith.constant 7 : i32
    %250 = arith.index_cast %c7_i32 : i32 to index
    %c0_74 = arith.constant 0 : index
    %c0_75 = arith.constant 0 : index
    %251 = vector.load %arg2[%250, %c0_74, %c0_75] : memref<8x2x512xf32, #tpu.memory_space<vmem>>, vector<1x2x512xf32>
    %252 = vector.shape_cast %251 : vector<1x2x512xf32> to vector<2x512xf32>
    %253 = arith.truncf %249 : vector<2x128xf32> to vector<2x128xbf16>
    %c0_76 = arith.constant 0 : index
    %c0_77 = arith.constant 0 : index
    %254 = vector.load %arg3[%c0_76, %c0_77] : memref<128x512xbf16, #tpu.memory_space<vmem>>, vector<128x512xbf16>
    %cst_78 = arith.constant dense<0.000000e+00> : vector<2x512xf32>
    %255 = tpu.matmul %253, %254, %cst_78 {dimension_numbers = #tpu.dot_dimension_numbers<[1], [0], [0], [1], [0, 0, 1, 1], [], []>} : vector<2x128xbf16>, vector<128x512xbf16>, vector<2x512xf32> -> vector<2x512xf32>
    %256 = arith.addf %252, %255 : vector<2x512xf32>
    %c0_79 = arith.constant 0 : index
    %c0_80 = arith.constant 0 : index
    %257 = vector.load %arg4[%c0_79, %c0_80] : memref<1x512xf32, #tpu.memory_space<vmem>>, vector<1x512xf32>
    %258 = vector.broadcast %257 : vector<1x512xf32> to vector<2x512xf32>
    %259 = arith.addf %256, %258 : vector<2x512xf32>
    %260 = vector.extract_strided_slice %259 {offsets = [0, 0], sizes = [2, 128], strides = [1, 1]} : vector<2x512xf32> to vector<2x128xf32>
    %261 = arith.negf %260 : vector<2x128xf32>
    %262 = math.exp %261 : vector<2x128xf32>
    %cst_81 = arith.constant 1.000000e+00 : f32
    %263 = vector.broadcast %cst_81 : f32 to vector<2x128xf32>
    %264 = arith.addf %263, %262 : vector<2x128xf32>
    %265 = arith.divf %263, %264 : vector<2x128xf32>
    %266 = vector.extract_strided_slice %259 {offsets = [0, 128], sizes = [2, 128], strides = [1, 1]} : vector<2x512xf32> to vector<2x128xf32>
    %267 = arith.negf %266 : vector<2x128xf32>
    %268 = math.exp %267 : vector<2x128xf32>
    %cst_82 = arith.constant 1.000000e+00 : f32
    %269 = vector.broadcast %cst_82 : f32 to vector<2x128xf32>
    %270 = arith.addf %269, %268 : vector<2x128xf32>
    %271 = arith.divf %269, %270 : vector<2x128xf32>
    %272 = vector.extract_strided_slice %259 {offsets = [0, 256], sizes = [2, 128], strides = [1, 1]} : vector<2x512xf32> to vector<2x128xf32>
    %273 = math.tanh %272 : vector<2x128xf32>
    %274 = vector.extract_strided_slice %259 {offsets = [0, 384], sizes = [2, 128], strides = [1, 1]} : vector<2x512xf32> to vector<2x128xf32>
    %275 = arith.negf %274 : vector<2x128xf32>
    %276 = math.exp %275 : vector<2x128xf32>
    %cst_83 = arith.constant 1.000000e+00 : f32
    %277 = vector.broadcast %cst_83 : f32 to vector<2x128xf32>
    %278 = arith.addf %277, %276 : vector<2x128xf32>
    %279 = arith.divf %277, %278 : vector<2x128xf32>
    %280 = arith.mulf %271, %247 : vector<2x128xf32>
    %281 = arith.mulf %265, %273 : vector<2x128xf32>
    %282 = arith.addf %280, %281 : vector<2x128xf32>
    %283 = math.tanh %282 : vector<2x128xf32>
    %284 = arith.mulf %279, %283 : vector<2x128xf32>
    %c8_i32 = arith.constant 8 : i32
    %c0_84 = arith.constant 0 : index
    %c0_85 = arith.constant 0 : index
    %285 = vector.load %arg10[%c0_84, %c0_85] : memref<2x128xf32, #tpu.memory_space<vmem>>, vector<2x128xf32>
    tpu.vector_store %arg10[%c0_84, %c0_85], %284 {strides = array<i32>} : memref<2x128xf32, #tpu.memory_space<vmem>>, vector<2x128xf32>,
    %c0_86 = arith.constant 0 : index
    %c0_87 = arith.constant 0 : index
    %286 = vector.load %arg11[%c0_86, %c0_87] : memref<2x128xf32, #tpu.memory_space<vmem>>, vector<2x128xf32>
    tpu.vector_store %arg11[%c0_86, %c0_87], %282 {strides = array<i32>} : memref<2x128xf32, #tpu.memory_space<vmem>>, vector<2x128xf32>,
    %c0_i32_88 = arith.constant 0 : i32
    %287 = arith.cmpi eq, %arg1, %c0_i32_88 : i32
    %288 = arith.extui %287 : i1 to i32
    %c0_i32_89 = arith.constant 0 : i32
    %289 = arith.cmpi ne, %288, %c0_i32_89 : i32
    scf.if %289 {
      %290 = arith.truncf %284 : vector<2x128xf32> to vector<2x128xbf16>
      %c0_90 = arith.constant 0 : index
      %c0_91 = arith.constant 0 : index
      %291 = vector.load %arg5[%c0_90, %c0_91] : memref<128x16xbf16, #tpu.memory_space<vmem>>, vector<128x16xbf16>
      %cst_92 = arith.constant dense<0.000000e+00> : vector<2x16xf32>
      %292 = tpu.matmul %290, %291, %cst_92 {dimension_numbers = #tpu.dot_dimension_numbers<[1], [0], [0], [1], [0, 0, 1, 1], [], []>} : vector<2x128xbf16>, vector<128x16xbf16>, vector<2x16xf32> -> vector<2x16xf32>
      %c0_93 = arith.constant 0 : index
      %c0_94 = arith.constant 0 : index
      %293 = vector.load %arg6[%c0_93, %c0_94] : memref<1x16xf32, #tpu.memory_space<vmem>>, vector<1x16xf32>
      %294 = vector.broadcast %293 : vector<1x16xf32> to vector<2x16xf32>
      %295 = arith.addf %292, %294 : vector<2x16xf32>
      %cst_95 = arith.constant 0.000000e+00 : f32
      %296 = vector.broadcast %cst_95 : f32 to vector<2x16xf32>
      %297 = arith.maximumf %295, %296 : vector<2x16xf32>
      %298 = arith.truncf %297 : vector<2x16xf32> to vector<2x16xbf16>
      %c0_96 = arith.constant 0 : index
      %c0_97 = arith.constant 0 : index
      %299 = vector.load %arg7[%c0_96, %c0_97] : memref<16x4xbf16, #tpu.memory_space<vmem>>, vector<16x4xbf16>
      %cst_98 = arith.constant dense<0.000000e+00> : vector<2x4xf32>
      %300 = tpu.matmul %298, %299, %cst_98 {dimension_numbers = #tpu.dot_dimension_numbers<[1], [0], [0], [1], [0, 0, 1, 1], [], []>} : vector<2x16xbf16>, vector<16x4xbf16>, vector<2x4xf32> -> vector<2x4xf32>
      %c0_99 = arith.constant 0 : index
      %c0_100 = arith.constant 0 : index
      %301 = vector.load %arg8[%c0_99, %c0_100] : memref<1x4xf32, #tpu.memory_space<vmem>>, vector<1x4xf32>
      %302 = vector.broadcast %301 : vector<1x4xf32> to vector<2x4xf32>
      %303 = arith.addf %300, %302 : vector<2x4xf32>
      %c0_101 = arith.constant 0 : index
      %c0_102 = arith.constant 0 : index
      %304 = vector.load %arg9[%c0_101, %c0_102] : memref<2x4xf32, #tpu.memory_space<vmem>>, vector<2x4xf32>
      tpu.vector_store %arg9[%c0_101, %c0_102], %303 {strides = array<i32>} : memref<2x4xf32, #tpu.memory_space<vmem>>, vector<2x4xf32>,
    } else {
    }
    return
  }
  func.func @transform_0(%arg0: i32, %arg1: i32) -> (i32, i32, i32) {
    %c0_i32 = arith.constant 0 : i32
    %c0_i32_0 = arith.constant 0 : i32
    return %arg1, %arg0, %c0_i32 : i32, i32, i32
  }
  func.func @transform_1(%arg0: i32, %arg1: i32) -> (i32, i32) {
    %c0_i32 = arith.constant 0 : i32
    %c0_i32_0 = arith.constant 0 : i32
    %c0_i32_1 = arith.constant 0 : i32
    return %c0_i32, %c0_i32_0 : i32, i32
  }
  func.func @transform_2(%arg0: i32, %arg1: i32) -> (i32, i32) {
    %c0_i32 = arith.constant 0 : i32
    %c0_i32_0 = arith.constant 0 : i32
    %c0_i32_1 = arith.constant 0 : i32
    return %c0_i32, %c0_i32_0 : i32, i32
  }
  func.func @transform_3(%arg0: i32, %arg1: i32) -> (i32, i32) {
    %c0_i32 = arith.constant 0 : i32
    %c0_i32_0 = arith.constant 0 : i32
    %c0_i32_1 = arith.constant 0 : i32
    return %c0_i32, %c0_i32_0 : i32, i32
  }
  func.func @transform_4(%arg0: i32, %arg1: i32) -> (i32, i32) {
    %c0_i32 = arith.constant 0 : i32
    %c0_i32_0 = arith.constant 0 : i32
    %c0_i32_1 = arith.constant 0 : i32
    return %c0_i32, %c0_i32_0 : i32, i32
  }
  func.func @transform_5(%arg0: i32, %arg1: i32) -> (i32, i32) {
    %c0_i32 = arith.constant 0 : i32
    %c0_i32_0 = arith.constant 0 : i32
    %c0_i32_1 = arith.constant 0 : i32
    return %c0_i32, %c0_i32_0 : i32, i32
  }
  func.func @transform_6(%arg0: i32, %arg1: i32) -> (i32, i32) {
    %c0_i32 = arith.constant 0 : i32
    %c0_i32_0 = arith.constant 0 : i32
    %c0_i32_1 = arith.constant 0 : i32
    return %c0_i32, %c0_i32_0 : i32, i32
  }
  func.func @transform_7(%arg0: i32, %arg1: i32) -> (i32, i32) {
    %c0_i32 = arith.constant 0 : i32
    %c0_i32_0 = arith.constant 0 : i32
    return %arg0, %c0_i32 : i32, i32
  }
}

</mosaic_0001>

<bundles_post_ra>
// kernel: tpu_custom_call.1
= control target key start
LH: loop header
LB: loop body
LE: loop exit
PB: predicated region body
PF: predicated region fallthrough
CT: control target
= control target key end

     0   :  { %12 = vsyncpa [#allocation5], 0  ;;  %s2538_s0 = inlined_call_operand.vmem [shape: f32[8,2,512], index: 0, kind: input, shape index: {}]   ;;  %s2539_s1 = inlined_call_operand.hbm [shape: bf16[128,512], index: 1, kind: input, shape index: {}]   ;;  %s2540_s2 = inlined_call_operand.vmem [shape: f32[1,512], index: 2, kind: input, shape index: {}]   ;;  %s2541_s3 = inlined_call_operand.vmem [shape: bf16[128,16], index: 3, kind: input, shape index: {}]   ;;  %s2542_s4 = inlined_call_operand.vmem [shape: f32[1,16], index: 4, kind: input, shape index: {}]   ;;  %s2543_s5 = inlined_call_operand.vmem [shape: bf16[16,4], index: 5, kind: input, shape index: {}]   ;;  %s2544_s6 = inlined_call_operand.vmem [shape: f32[1,4], index: 6, kind: input, shape index: {}]   ;;  %s2545_s7 = inlined_call_operand.hbm [shape: f32[2,4], index: 7, kind: output, shape index: {}]  }
   0x1   :  { %13 = vsyncpa [#allocation6], 0  ;;  %s1977_s24 = smov [#allocation4]   ;;  %s1929_s28 = scalar_lea.hbm %s2539_s1, 4096 }
   0x2   :  { %s21_s25 = sshll.u32 %s1977_s24, 4  ;;  %p1930_p0 = scmp.ne.s32.totalorder %s2539_s1, %s1929_s28  ;;  %s22_s25 = int_to_ptr.vmem [resolvable:$true] %s21_s25 }
   0x3   :  { %p1933_p1 = scmp.lt.u32.totalorder %s1929_s28, %s2539_s1 }
   0x5   :  { %p1935_p2 = pnand %p1933_p1, %p1930_p0 }
   0x7   :  { %1938 = shalt.err (!%p1935_p2)
}
   0x8   :  { %s1939_s10 = scalar_lea.vmem %s22_s25, 4096  ;;  %p1944_p4 = scmp.lt.s32.totalorder %s22_s25, %s22_s25 }
   0x9   :  { %p1940_p3 = scmp.ne.s32.totalorder %s22_s25, %s1939_s10  ;;  %p1945_p5 = scmp.lt.s32.totalorder %s1939_s10, %s1939_s10 }
   0xb   :  { %p1946_p6 = por %p1945_p5, %p1944_p4 }
   0xd   :  { %p1947_p7 = pnand %p1946_p6, %p1940_p3 }
   0xf   :  { %1950 = shalt.err (!%p1947_p7)
}
  0x10   :  { %s1978_s11 = smov 256   ;;  %s1979_s12 = smov 16  }
  0x11   :  { %27 = dma.hbm_to_vmem [thread:$0]  %s2539_s1, 4096, %s22_s25, [#allocation5], %s1978_s11, %s1978_s11, %s1979_s12  }
  0x12   :  { %1973 = dma.done.wait [#allocation5], 4096  }
  0x13   :  { %1974 = vsyncadd [#allocation5], 4294963200  ;;  %v1980_v0 = vmov 0   ;;  %v1981_v1 = vmov 0.0   ;;  %v2041_v2 = vld [vmem:[#allocation4 + $0x4] ss:$16 sps:$4 sm:$0xff]   ;;  %v335_v36 = vlaneseq }
  0x14   :  { %276 = vmatprep.mubr.bf16.mxu0 %v1980_v0  ;;  %317 = vmatprep.mubr.bf16.mxu1 %v1980_v0  ;;  %46 = vst [vmem:[#allocation2] sm:$0x3] %v1981_v1  ;;  %47 = vst [vmem:[#allocation3] sm:$0x3] %v1981_v1  ;;  %v2043_v3 = vld [vmem:[#allocation4 + $0xc] ss:$16 sps:$4 sm:$0xff]  }
  0x15   :  { %244 = vmatprep.subr.bf16.mxu0 %v2041_v2  ;;  %v2046_v4 = vld [vmem:[#allocation4] ss:$16 sps:$4 sm:$0xff]   ;;  %v2048_v5 = vld [vmem:[#allocation4 + $0x8] ss:$16 sps:$4 sm:$0xff]   ;;  %285 = vmatprep.subr.bf16.mxu1 %v2043_v3  ;;  %v2051_v6 = vld [vmem:[#allocation4 + $0x24] ss:$16 sps:$4 sm:$0xff]  }
  0x16   :  { %245 = vmatpush1.bf16.msra.mxu0 %v2046_v4  ;;  %286 = vmatpush1.bf16.msra.mxu1 %v2048_v5  ;;  %v2055_v7 = vld [vmem:[#allocation4 + $0x2c] ss:$16 sps:$4 sm:$0xff]   ;;  %v2057_v8 = vld [vmem:[#allocation4 + $0x20] ss:$16 sps:$4 sm:$0xff]   ;;  %v2060_v9 = vld [vmem:[#allocation4 + $0x28] ss:$16 sps:$4 sm:$0xff]  }
  0x17   :  { %246 = vmatprep.subr.bf16.mxu0 %v2051_v6  ;;  %287 = vmatprep.subr.bf16.mxu1 %v2055_v7  ;;  %v2063_v10 = vld [vmem:[#allocation4 + $0x44] ss:$16 sps:$4 sm:$0xff]   ;;  %v2065_v11 = vld [vmem:[#allocation4 + $0x4c] ss:$16 sps:$4 sm:$0xff]   ;;  %v2067_v12 = vld [vmem:[#allocation4 + $0x40] ss:$16 sps:$4 sm:$0xff]  }
  0x18   :  { %v2069_v13 = vld [vmem:[#allocation4 + $0x48] ss:$16 sps:$4 sm:$0xff]   ;;  %v2073_v14 = vld [vmem:[#allocation4 + $0x64] ss:$16 sps:$4 sm:$0xff]   ;;  %v2077_v15 = vld [vmem:[#allocation4 + $0x6c] ss:$16 sps:$4 sm:$0xff]  }
  0x19   :  { %v2079_v16 = vld [vmem:[#allocation4 + $0x60] ss:$16 sps:$4 sm:$0xff]   ;;  %v2083_v17 = vld [vmem:[#allocation4 + $0x68] ss:$16 sps:$4 sm:$0xff]   ;;  %v2085_v18 = vld [vmem:[#allocation4 + $0x84] ss:$16 sps:$4 sm:$0xff]  }
  0x1a   :  { %247 = vmatpush1.bf16.msra.mxu0 %v2057_v8  ;;  %288 = vmatpush1.bf16.msra.mxu1 %v2060_v9  ;;  %v2089_v19 = vld [vmem:[#allocation4 + $0x8c] ss:$16 sps:$4 sm:$0xff]   ;;  %v2091_v20 = vld [vmem:[#allocation4 + $0x80] ss:$16 sps:$4 sm:$0xff]   ;;  %v2093_v21 = vld [vmem:[#allocation4 + $0x88] ss:$16 sps:$4 sm:$0xff]  }
  0x1b   :  { %248 = vmatprep.subr.bf16.mxu0 %v2063_v10  ;;  %289 = vmatprep.subr.bf16.mxu1 %v2065_v11  ;;  %v2097_v22 = vld [vmem:[#allocation4 + $0xa4] ss:$16 sps:$4 sm:$0xff]   ;;  %v2101_v23 = vld [vmem:[#allocation4 + $0xac] ss:$16 sps:$4 sm:$0xff]   ;;  %v2105_v24 = vld [vmem:[#allocation4 + $0xa0] ss:$16 sps:$4 sm:$0xff]  }
  0x1c   :  { %v2107_v25 = vld [vmem:[#allocation4 + $0xa8] ss:$16 sps:$4 sm:$0xff]   ;;  %v2111_v26 = vld [vmem:[#allocation4 + $0xc4] ss:$16 sps:$4 sm:$0xff]   ;;  %v2113_v27 = vld [vmem:[#allocation4 + $0xcc] ss:$16 sps:$4 sm:$0xff]  }
  0x1d   :  { %v2115_v28 = vld [vmem:[#allocation4 + $0xc0] ss:$16 sps:$4 sm:$0xff]   ;;  %v2117_v29 = vld [vmem:[#allocation4 + $0xc8] ss:$16 sps:$4 sm:$0xff]   ;;  %v2119_v30 = vld [vmem:[#allocation4 + $0xe4] ss:$16 sps:$4 sm:$0xff]  }
  0x1e   :  { %249 = vmatpush1.bf16.msra.mxu0 %v2067_v12  ;;  %290 = vmatpush1.bf16.msra.mxu1 %v2069_v13  ;;  %v2121_v31 = vld [vmem:[#allocation4 + $0xec] ss:$16 sps:$4 sm:$0xff]   ;;  %v2129_v32 = vld [vmem:[#allocation4 + $0xe0] ss:$16 sps:$4 sm:$0xff]   ;;  %v2131_v33 = vld [vmem:[#allocation4 + $0xe8] ss:$16 sps:$4 sm:$0xff]  }
  0x1f   :  { %250 = vmatprep.subr.bf16.mxu0 %v2073_v14  ;;  %291 = vmatprep.subr.bf16.mxu1 %v2077_v15  ;;  %v48_v34 = vld [vmem:[#allocation2] sm:$0x3]  ;;  %v336_v37 = vshrl.u32 %v335_v36, 7  ;;  %v1982_v43 = vmov 1983009808   ;;  %vm1983_vm0 = vmmov 0  }
  0x20   :  { %v51_v35 = vpack.c.bf16 %v48_v34, %v48_v34  ;;  %v349_v42 = vld [vmem:[%s2540_s2] sm:$0xf]  ;;  %v333_v44 = vunpack.c.l.s4 %v1982_v43  ;;  %vm1531_vm1 = vcmask 130048   ;;  %s1984_s25 = smov [#allocation7]   ;;  %vm1575_vm2 = vcmask 25600  }
  0x21   :  { %v353_v38 = vsub.s32 0, %v336_v37  ;;  %v357_v39 = vsub.s32 1, %v336_v37  ;;  %v361_v40 = vsub.s32 2, %v336_v37  ;;  %v365_v41 = vsub.s32 3, %v336_v37  ;;  %s1583_s26 = sshll.u32 %s1984_s25, 4  ;;  %s1584_s26 = int_to_ptr.vmem [resolvable:$true] %s1583_s26 }
  0x22   :  { %251 = vmatpush1.bf16.msra.mxu0 %v2079_v16  ;;  %292 = vmatpush1.bf16.msra.mxu1 %v2083_v17  ;;  %v334_v49 = vunpack.c.0.s8 %v333_v44  ;;  %p1956_p9 = scmp.lt.s32.totalorder %s1584_s26, %s1584_s26 }
  0x23   :  { %252 = vmatprep.subr.bf16.mxu0 %v2085_v18  ;;  %293 = vmatprep.subr.bf16.mxu1 %v2089_v19  ;;  %v354_v45 = vrot.slane %v349_v42, %v353_v38  ;;  %v358_v46 = vrot.slane %v349_v42, %v357_v39  ;;  %v362_v47 = vrot.slane %v349_v42, %v361_v40 }
  0x24   :  { %v366_v48 = vrot.slane %v349_v42, %v365_v41  ;;  %v2176_v54 = vsub.s32 %v334_v49, %v336_v37  ;;  %v50_v37 = vld [vmem:[%s2538_s0] sm:$0xff] }
  0x25   :  { %v367_v50 = vcombine.low %v354_v45, %v358_v46 }
  0x26   :  { %253 = vmatpush1.bf16.msra.mxu0 %v2091_v20  ;;  %294 = vmatpush1.bf16.msra.mxu1 %v2093_v21  ;;  %v368_v51 = vcombine.low %v362_v47, %v366_v48 }
  0x27   :  { %254 = vmatprep.subr.bf16.mxu0 %v2097_v22  ;;  %295 = vmatprep.subr.bf16.mxu1 %v2101_v23  ;;  %v375_v59 = vrot.slane %v367_v50, %v2176_v54 }
  0x28   :  { %v382_v60 = vrot.slane %v368_v51, %v2176_v54 }
  0x2a   :  { %255 = vmatpush1.bf16.msra.mxu0 %v2105_v24  ;;  %296 = vmatpush1.bf16.msra.mxu1 %v2107_v25  ;;  %v2185_v39 = vcombine.low %v375_v59, %v382_v60 }
  0x2b   :  { %256 = vmatprep.subr.bf16.mxu0 %v2111_v26  ;;  %297 = vmatprep.subr.bf16.mxu1 %v2113_v27 }
  0x2e   :  { %257 = vmatpush1.bf16.msra.mxu0 %v2115_v28  ;;  %298 = vmatpush1.bf16.msra.mxu1 %v2117_v29 }
  0x2f   :  { %258 = vmatprep.subr.bf16.mxu0 %v2119_v30  ;;  %299 = vmatprep.subr.bf16.mxu1 %v2121_v31 }
  0x32   :  { %259 = vmatpush1.bf16.msra.mxu0 %v2129_v32  ;;  %300 = vmatpush1.bf16.msra.mxu1 %v2131_v33 }
  0x33   :  { %420 = vmatprep.subr.bf16.mxu0 %v2041_v2  ;;  %461 = vmatprep.subr.bf16.mxu1 %v2043_v3 }
  0x35   :  { %277 = vmatmul.mubr.bf16.vlgmr.msra.gmra.mrb[0].mxu0 %v51_v35  ;;  %318 = vmatmul.mubr.bf16.vlgmr.msra.gmra.mrb[0].mxu1 %v51_v35 }
  0x36   :  { %421 = vmatpush1.bf16.msra.mxu0 %v2046_v4  ;;  %462 = vmatpush1.bf16.msra.mxu1 %v2048_v5 }
  0x37   :  { %422 = vmatprep.subr.bf16.mxu0 %v2051_v6  ;;  %463 = vmatprep.subr.bf16.mxu1 %v2055_v7 }
  0x38   :  { %452 = vmatprep.mubr.bf16.mxu0 %v1980_v0  ;;  %493 = vmatprep.mubr.bf16.mxu1 %v1980_v0 }
  0x3a   :  { %423 = vmatpush1.bf16.msra.mxu0 %v2057_v8  ;;  %464 = vmatpush1.bf16.msra.mxu1 %v2060_v9 }
  0x3b   :  { %424 = vmatprep.subr.bf16.mxu0 %v2063_v10  ;;  %465 = vmatprep.subr.bf16.mxu1 %v2065_v11 }
  0x3e   :  { %425 = vmatpush1.bf16.msra.mxu0 %v2067_v12  ;;  %466 = vmatpush1.bf16.msra.mxu1 %v2069_v13 }
  0x3f   :  { %426 = vmatprep.subr.bf16.mxu0 %v2073_v14  ;;  %467 = vmatprep.subr.bf16.mxu1 %v2077_v15 }
  0x42   :  { %427 = vmatpush1.bf16.msra.mxu0 %v2079_v16  ;;  %468 = vmatpush1.bf16.msra.mxu1 %v2083_v17 }
  0x43   :  { %428 = vmatprep.subr.bf16.mxu0 %v2085_v18  ;;  %469 = vmatprep.subr.bf16.mxu1 %v2089_v19 }
  0x46   :  { %429 = vmatpush1.bf16.msra.mxu0 %v2091_v20  ;;  %470 = vmatpush1.bf16.msra.mxu1 %v2093_v21 }
  0x47   :  { %430 = vmatprep.subr.bf16.mxu0 %v2097_v22  ;;  %471 = vmatprep.subr.bf16.mxu1 %v2101_v23 }
  0x4a   :  { %431 = vmatpush1.bf16.msra.mxu0 %v2105_v24  ;;  %472 = vmatpush1.bf16.msra.mxu1 %v2107_v25 }
  0x4b   :  { %432 = vmatprep.subr.bf16.mxu0 %v2111_v26  ;;  %473 = vmatprep.subr.bf16.mxu1 %v2113_v27 }
  0x4e   :  { %433 = vmatpush1.bf16.msra.mxu0 %v2115_v28  ;;  %474 = vmatpush1.bf16.msra.mxu1 %v2117_v29 }
  0x4f   :  { %434 = vmatprep.subr.bf16.mxu0 %v2119_v30  ;;  %475 = vmatprep.subr.bf16.mxu1 %v2121_v31 }
  0x52   :  { %435 = vmatpush1.bf16.msra.mxu0 %v2129_v32  ;;  %476 = vmatpush1.bf16.msra.mxu1 %v2131_v33 }
  0x53   :  { %560 = vmatprep.subr.bf16.mxu0 %v2041_v2  ;;  %601 = vmatprep.subr.bf16.mxu1 %v2043_v3 }
 0x108   :  { %v278_v52 = vpop.f32.mrb[0].mxu0  ;;  %v319_v53 = vpop.f32.mrb[0].mxu1 }
 0x109   :  { %v280_v55 = vpop.f32.mrb[1].mxu0  ;;  %v321_v56 = vpop.f32.mrb[1].mxu1 }
 0x10a   :  { %v330_v57 = vcombine.low %v278_v52, %v280_v55  ;;  %v331_v58 = vcombine.low %v319_v53, %v321_v56  ;;  %v282_v61 = vpop.f32.mrb[2].mxu0  ;;  %v323_v62 = vpop.f32.mrb[2].mxu1  ;;  %v49_v55 = vld [vmem:[#allocation3] sm:$0x3] }
 0x10b   :  { %v283_v63 = vpop.f32.mrb[3].mxu0  ;;  %v324_v34 = vpop.f32.mrb[3].mxu1 }
 0x10c   :  { %v338_v35 = vrot.slane %v330_v57, %v2176_v54  ;;  %v345_v36 = vrot.slane %v331_v58, %v2176_v54 }
 0x10e   :  { %v346_v38 = vcombine.low %v338_v35, %v345_v36 }
 0x110   :  { %v348_v40 = vadd.f32 %v346_v38, %v50_v37 }
 0x112   :  { %v385_v41 = vadd.f32 %v2185_v39, %v348_v40 }
 0x114   :  { %v1624_v42 = vmul.f32 -1.442695, %v385_v41  ;;  %v393_v43 = vrot.slane %v385_v41, 2  ;;  %v404_v45 = vrot.slane %v385_v41, 6  ;;  %v401_v48 = vrot.slane %v385_v41, 4 }
 0x116   :  { %1769 = vpow2.f32 %v1624_v42  ;;  %v1625_v44 = vmul.f32 -1.442695, %v393_v43  ;;  %v1626_v46 = vmul.f32 -1.442695, %v404_v45 }
 0x118   :  { %1771 = vpow2.f32 %v1625_v44 }
 0x119   :  { %1773 = vpow2.f32 %v1626_v46 }
 0x120   :  { %v1770_v47 = vpop.eup %1769 }
 0x121   :  { %v389_v49 = vadd.f32 1.0, %v1770_v47 }
 0x122   :  { %v1772_v50 = vpop.eup %1771 }
 0x123   :  { %1775 = vrcp.f32 %v389_v49  ;;  %v398_v51 = vadd.f32 1.0, %v1772_v50  ;;  %v1774_v52 = vpop.eup %1773  ;;  %v1627_v49 = vld [vmem:[%s2538_s0 + $0x8] sm:$0xff] }
 0x124   :  { %1777 = vtanh.f32 %v401_v48  ;;  %v409_v58 = vadd.f32 1.0, %v1774_v52 }
 0x125   :  { %1779 = vrcp.f32 %v398_v51 }
 0x126   :  { %1781 = vrcp.f32 %v409_v58 }
 0x12d   :  { %v1776_v53 = vpop.eup %1775 }
 0x12e   :  { %v1778_v56 = vpop.eup %1777 }
 0x12f   :  { %v1780_v57 = vpop.eup %1779  ;;  %v413_v60 = vmul.f32 %v1778_v56, %v1776_v53 }
 0x130   :  { %v412_v59 = vmul.f32 %v1780_v57, %v49_v55  ;;  %v1782_v62 = vpop.eup %1781 }
 0x132   :  { %v2188_v61 = vadd.f32 %v413_v60, %v412_v59 }
 0x134   :  { %1783 = vtanh.f32 %v2188_v61 }
 0x13e   :  { %v1784_v63 = vpop.eup %1783 }
 0x13f   :  { %v416_v34 = vmul.f32 %v1784_v63, %v1782_v62 }
 0x141   :  { %v419_v35 = vpack.c.bf16 %v416_v34, %v416_v34 }
 0x143   :  { %453 = vmatmul.mubr.bf16.vlgmr.msra.gmra.mrb[4].mxu0 %v419_v35  ;;  %494 = vmatmul.mubr.bf16.vlgmr.msra.gmra.mrb[4].mxu1 %v419_v35 }
 0x144   :  { %561 = vmatpush1.bf16.msra.mxu0 %v2046_v4  ;;  %602 = vmatpush1.bf16.msra.mxu1 %v2048_v5 }
 0x145   :  { %562 = vmatprep.subr.bf16.mxu0 %v2051_v6  ;;  %603 = vmatprep.subr.bf16.mxu1 %v2055_v7 }
 0x146   :  { %592 = vmatprep.mubr.bf16.mxu0 %v1980_v0  ;;  %633 = vmatprep.mubr.bf16.mxu1 %v1980_v0 }
 0x148   :  { %563 = vmatpush1.bf16.msra.mxu0 %v2057_v8  ;;  %604 = vmatpush1.bf16.msra.mxu1 %v2060_v9 }
 0x149   :  { %564 = vmatprep.subr.bf16.mxu0 %v2063_v10  ;;  %605 = vmatprep.subr.bf16.mxu1 %v2065_v11 }
 0x14c   :  { %565 = vmatpush1.bf16.msra.mxu0 %v2067_v12  ;;  %606 = vmatpush1.bf16.msra.mxu1 %v2069_v13 }
 0x14d   :  { %566 = vmatprep.subr.bf16.mxu0 %v2073_v14  ;;  %607 = vmatprep.subr.bf16.mxu1 %v2077_v15 }
 0x150   :  { %567 = vmatpush1.bf16.msra.mxu0 %v2079_v16  ;;  %608 = vmatpush1.bf16.msra.mxu1 %v2083_v17 }
 0x151   :  { %568 = vmatprep.subr.bf16.mxu0 %v2085_v18  ;;  %609 = vmatprep.subr.bf16.mxu1 %v2089_v19 }
 0x154   :  { %569 = vmatpush1.bf16.msra.mxu0 %v2091_v20  ;;  %610 = vmatpush1.bf16.msra.mxu1 %v2093_v21 }
 0x155   :  { %570 = vmatprep.subr.bf16.mxu0 %v2097_v22  ;;  %611 = vmatprep.subr.bf16.mxu1 %v2101_v23 }
 0x158   :  { %571 = vmatpush1.bf16.msra.mxu0 %v2105_v24  ;;  %612 = vmatpush1.bf16.msra.mxu1 %v2107_v25 }
 0x159   :  { %572 = vmatprep.subr.bf16.mxu0 %v2111_v26  ;;  %613 = vmatprep.subr.bf16.mxu1 %v2113_v27 }
 0x15c   :  { %573 = vmatpush1.bf16.msra.mxu0 %v2115_v28  ;;  %614 = vmatpush1.bf16.msra.mxu1 %v2117_v29 }
 0x15d   :  { %574 = vmatprep.subr.bf16.mxu0 %v2119_v30  ;;  %615 = vmatprep.subr.bf16.mxu1 %v2121_v31 }
 0x160   :  { %575 = vmatpush1.bf16.msra.mxu0 %v2129_v32  ;;  %616 = vmatpush1.bf16.msra.mxu1 %v2131_v33 }
 0x161   :  { %700 = vmatprep.subr.bf16.mxu0 %v2041_v2  ;;  %741 = vmatprep.subr.bf16.mxu1 %v2043_v3 }
 0x216   :  { %v454_v36 = vpop.f32.mrb[4].mxu0  ;;  %v495_v37 = vpop.f32.mrb[4].mxu1 }
 0x217   :  { %v456_v38 = vpop.f32.mrb[5].mxu0  ;;  %v497_v40 = vpop.f32.mrb[5].mxu1 }
 0x218   :  { %v506_v41 = vcombine.low %v454_v36, %v456_v38  ;;  %v507_v42 = vcombine.low %v495_v37, %v497_v40  ;;  %v458_v43 = vpop.f32.mrb[6].mxu0  ;;  %v499_v44 = vpop.f32.mrb[6].mxu1 }
 0x219   :  { %v459_v45 = vpop.f32.mrb[7].mxu0  ;;  %v500_v46 = vpop.f32.mrb[7].mxu1 }
 0x21a   :  { %v514_v47 = vrot.slane %v506_v41, %v2176_v54  ;;  %v521_v48 = vrot.slane %v507_v42, %v2176_v54 }
 0x21c   :  { %v522_v50 = vcombine.low %v514_v47, %v521_v48 }
 0x21e   :  { %v524_v51 = vadd.f32 %v1627_v49, %v522_v50 }
 0x220   :  { %v525_v52 = vadd.f32 %v524_v51, %v2185_v39 }
 0x222   :  { %v1628_v53 = vmul.f32 -1.442695, %v525_v52  ;;  %v533_v55 = vrot.slane %v525_v52, 2  ;;  %v544_v57 = vrot.slane %v525_v52, 6  ;;  %v541_v60 = vrot.slane %v525_v52, 4 }
 0x224   :  { %1785 = vpow2.f32 %v1628_v53  ;;  %v1629_v56 = vmul.f32 -1.442695, %v533_v55  ;;  %v1630_v58 = vmul.f32 -1.442695, %v544_v57 }
 0x226   :  { %1787 = vpow2.f32 %v1629_v56 }
 0x227   :  { %1789 = vpow2.f32 %v1630_v58 }
 0x22e   :  { %v1786_v59 = vpop.eup %1785 }
 0x22f   :  { %v529_v62 = vadd.f32 1.0, %v1786_v59 }
 0x230   :  { %v1788_v63 = vpop.eup %1787 }
 0x231   :  { %1791 = vrcp.f32 %v529_v62  ;;  %v538_v34 = vadd.f32 1.0, %v1788_v63  ;;  %v1790_v35 = vpop.eup %1789 }
 0x232   :  { %1793 = vtanh.f32 %v541_v60  ;;  %v549_v40 = vadd.f32 1.0, %v1790_v35  ;;  %v1631_v60 = vld [vmem:[%s2538_s0 + $0x10] sm:$0xff] }
 0x233   :  { %1795 = vrcp.f32 %v538_v34 }
 0x234   :  { %1797 = vrcp.f32 %v549_v40 }
 0x23b   :  { %v1792_v36 = vpop.eup %1791 }
 0x23c   :  { %v1794_v37 = vpop.eup %1793 }
 0x23d   :  { %v1796_v38 = vpop.eup %1795  ;;  %v553_v42 = vmul.f32 %v1794_v37, %v1792_v36 }
 0x23e   :  { %v552_v41 = vmul.f32 %v1796_v38, %v2188_v61  ;;  %v1798_v44 = vpop.eup %1797 }
 0x240   :  { %v2232_v43 = vadd.f32 %v553_v42, %v552_v41 }
 0x242   :  { %1799 = vtanh.f32 %v2232_v43 }
 0x24c   :  { %v1800_v45 = vpop.eup %1799 }
 0x24d   :  { %v556_v46 = vmul.f32 %v1800_v45, %v1798_v44 }
 0x24f   :  { %v559_v47 = vpack.c.bf16 %v556_v46, %v556_v46 }
 0x251   :  { %593 = vmatmul.mubr.bf16.vlgmr.msra.gmra.mrb[8].mxu0 %v559_v47  ;;  %634 = vmatmul.mubr.bf16.vlgmr.msra.gmra.mrb[8].mxu1 %v559_v47 }
 0x252   :  { %701 = vmatpush1.bf16.msra.mxu0 %v2046_v4  ;;  %742 = vmatpush1.bf16.msra.mxu1 %v2048_v5 }
 0x253   :  { %702 = vmatprep.subr.bf16.mxu0 %v2051_v6  ;;  %743 = vmatprep.subr.bf16.mxu1 %v2055_v7 }
 0x254   :  { %732 = vmatprep.mubr.bf16.mxu0 %v1980_v0  ;;  %773 = vmatprep.mubr.bf16.mxu1 %v1980_v0 }
 0x256   :  { %703 = vmatpush1.bf16.msra.mxu0 %v2057_v8  ;;  %744 = vmatpush1.bf16.msra.mxu1 %v2060_v9 }
 0x257   :  { %704 = vmatprep.subr.bf16.mxu0 %v2063_v10  ;;  %745 = vmatprep.subr.bf16.mxu1 %v2065_v11 }
 0x25a   :  { %705 = vmatpush1.bf16.msra.mxu0 %v2067_v12  ;;  %746 = vmatpush1.bf16.msra.mxu1 %v2069_v13 }
 0x25b   :  { %706 = vmatprep.subr.bf16.mxu0 %v2073_v14  ;;  %747 = vmatprep.subr.bf16.mxu1 %v2077_v15 }
 0x25e   :  { %707 = vmatpush1.bf16.msra.mxu0 %v2079_v16  ;;  %748 = vmatpush1.bf16.msra.mxu1 %v2083_v17 }
 0x25f   :  { %708 = vmatprep.subr.bf16.mxu0 %v2085_v18  ;;  %749 = vmatprep.subr.bf16.mxu1 %v2089_v19 }
 0x262   :  { %709 = vmatpush1.bf16.msra.mxu0 %v2091_v20  ;;  %750 = vmatpush1.bf16.msra.mxu1 %v2093_v21 }
 0x263   :  { %710 = vmatprep.subr.bf16.mxu0 %v2097_v22  ;;  %751 = vmatprep.subr.bf16.mxu1 %v2101_v23 }
 0x266   :  { %711 = vmatpush1.bf16.msra.mxu0 %v2105_v24  ;;  %752 = vmatpush1.bf16.msra.mxu1 %v2107_v25 }
 0x267   :  { %712 = vmatprep.subr.bf16.mxu0 %v2111_v26  ;;  %753 = vmatprep.subr.bf16.mxu1 %v2113_v27 }
 0x26a   :  { %713 = vmatpush1.bf16.msra.mxu0 %v2115_v28  ;;  %754 = vmatpush1.bf16.msra.mxu1 %v2117_v29 }
 0x26b   :  { %714 = vmatprep.subr.bf16.mxu0 %v2119_v30  ;;  %755 = vmatprep.subr.bf16.mxu1 %v2121_v31 }
 0x26e   :  { %715 = vmatpush1.bf16.msra.mxu0 %v2129_v32  ;;  %756 = vmatpush1.bf16.msra.mxu1 %v2131_v33 }
 0x26f   :  { %840 = vmatprep.subr.bf16.mxu0 %v2041_v2  ;;  %881 = vmatprep.subr.bf16.mxu1 %v2043_v3 }
 0x324   :  { %v594_v61 = vpop.f32.mrb[8].mxu0  ;;  %v635_v48 = vpop.f32.mrb[8].mxu1 }
 0x325   :  { %v596_v49 = vpop.f32.mrb[9].mxu0  ;;  %v637_v50 = vpop.f32.mrb[9].mxu1 }
 0x326   :  { %v646_v51 = vcombine.low %v594_v61, %v596_v49  ;;  %v647_v52 = vcombine.low %v635_v48, %v637_v50  ;;  %v598_v53 = vpop.f32.mrb[10].mxu0  ;;  %v639_v55 = vpop.f32.mrb[10].mxu1 }
 0x327   :  { %v599_v56 = vpop.f32.mrb[11].mxu0  ;;  %v640_v57 = vpop.f32.mrb[11].mxu1 }
 0x328   :  { %v654_v58 = vrot.slane %v646_v51, %v2176_v54  ;;  %v661_v59 = vrot.slane %v647_v52, %v2176_v54 }
 0x32a   :  { %v662_v62 = vcombine.low %v654_v58, %v661_v59 }
 0x32c   :  { %v664_v63 = vadd.f32 %v1631_v60, %v662_v62 }
 0x32e   :  { %v665_v34 = vadd.f32 %v664_v63, %v2185_v39 }
 0x330   :  { %v1632_v35 = vmul.f32 -1.442695, %v665_v34  ;;  %v673_v36 = vrot.slane %v665_v34, 2  ;;  %v684_v38 = vrot.slane %v665_v34, 6  ;;  %v681_v42 = vrot.slane %v665_v34, 4 }
 0x332   :  { %1801 = vpow2.f32 %v1632_v35  ;;  %v1633_v37 = vmul.f32 -1.442695, %v673_v36  ;;  %v1634_v40 = vmul.f32 -1.442695, %v684_v38 }
 0x334   :  { %1803 = vpow2.f32 %v1633_v37 }
 0x335   :  { %1805 = vpow2.f32 %v1634_v40 }
 0x33c   :  { %v1802_v41 = vpop.eup %1801 }
 0x33d   :  { %v669_v44 = vadd.f32 1.0, %v1802_v41 }
 0x33e   :  { %v1804_v45 = vpop.eup %1803 }
 0x33f   :  { %1807 = vrcp.f32 %v669_v44  ;;  %v678_v46 = vadd.f32 1.0, %v1804_v45  ;;  %v1806_v47 = vpop.eup %1805 }
 0x340   :  { %1809 = vtanh.f32 %v681_v42  ;;  %v689_v50 = vadd.f32 1.0, %v1806_v47  ;;  %v1635_v42 = vld [vmem:[%s2538_s0 + $0x18] sm:$0xff] }
 0x341   :  { %1811 = vrcp.f32 %v678_v46 }
 0x342   :  { %1813 = vrcp.f32 %v689_v50 }
 0x349   :  { %v1808_v61 = vpop.eup %1807 }
 0x34a   :  { %v1810_v48 = vpop.eup %1809 }
 0x34b   :  { %v1812_v49 = vpop.eup %1811  ;;  %v693_v52 = vmul.f32 %v1810_v48, %v1808_v61 }
 0x34c   :  { %v692_v51 = vmul.f32 %v1812_v49, %v2232_v43  ;;  %v1814_v55 = vpop.eup %1813 }
 0x34e   :  { %v2276_v53 = vadd.f32 %v693_v52, %v692_v51 }
 0x350   :  { %1815 = vtanh.f32 %v2276_v53 }
 0x35a   :  { %v1816_v56 = vpop.eup %1815 }
 0x35b   :  { %v696_v57 = vmul.f32 %v1816_v56, %v1814_v55 }
 0x35d   :  { %v699_v58 = vpack.c.bf16 %v696_v57, %v696_v57 }
 0x35f   :  { %733 = vmatmul.mubr.bf16.vlgmr.msra.gmra.mrb[12].mxu0 %v699_v58  ;;  %774 = vmatmul.mubr.bf16.vlgmr.msra.gmra.mrb[12].mxu1 %v699_v58 }
 0x360   :  { %841 = vmatpush1.bf16.msra.mxu0 %v2046_v4  ;;  %882 = vmatpush1.bf16.msra.mxu1 %v2048_v5 }
 0x361   :  { %842 = vmatprep.subr.bf16.mxu0 %v2051_v6  ;;  %883 = vmatprep.subr.bf16.mxu1 %v2055_v7 }
 0x362   :  { %872 = vmatprep.mubr.bf16.mxu0 %v1980_v0  ;;  %913 = vmatprep.mubr.bf16.mxu1 %v1980_v0 }
 0x364   :  { %843 = vmatpush1.bf16.msra.mxu0 %v2057_v8  ;;  %884 = vmatpush1.bf16.msra.mxu1 %v2060_v9 }
 0x365   :  { %844 = vmatprep.subr.bf16.mxu0 %v2063_v10  ;;  %885 = vmatprep.subr.bf16.mxu1 %v2065_v11 }
 0x368   :  { %845 = vmatpush1.bf16.msra.mxu0 %v2067_v12  ;;  %886 = vmatpush1.bf16.msra.mxu1 %v2069_v13 }
 0x369   :  { %846 = vmatprep.subr.bf16.mxu0 %v2073_v14  ;;  %887 = vmatprep.subr.bf16.mxu1 %v2077_v15 }
 0x36c   :  { %847 = vmatpush1.bf16.msra.mxu0 %v2079_v16  ;;  %888 = vmatpush1.bf16.msra.mxu1 %v2083_v17 }
 0x36d   :  { %848 = vmatprep.subr.bf16.mxu0 %v2085_v18  ;;  %889 = vmatprep.subr.bf16.mxu1 %v2089_v19 }
 0x370   :  { %849 = vmatpush1.bf16.msra.mxu0 %v2091_v20  ;;  %890 = vmatpush1.bf16.msra.mxu1 %v2093_v21 }
 0x371   :  { %850 = vmatprep.subr.bf16.mxu0 %v2097_v22  ;;  %891 = vmatprep.subr.bf16.mxu1 %v2101_v23 }
 0x374   :  { %851 = vmatpush1.bf16.msra.mxu0 %v2105_v24  ;;  %892 = vmatpush1.bf16.msra.mxu1 %v2107_v25 }
 0x375   :  { %852 = vmatprep.subr.bf16.mxu0 %v2111_v26  ;;  %893 = vmatprep.subr.bf16.mxu1 %v2113_v27 }
 0x378   :  { %853 = vmatpush1.bf16.msra.mxu0 %v2115_v28  ;;  %894 = vmatpush1.bf16.msra.mxu1 %v2117_v29 }
 0x379   :  { %854 = vmatprep.subr.bf16.mxu0 %v2119_v30  ;;  %895 = vmatprep.subr.bf16.mxu1 %v2121_v31 }
 0x37c   :  { %855 = vmatpush1.bf16.msra.mxu0 %v2129_v32  ;;  %896 = vmatpush1.bf16.msra.mxu1 %v2131_v33 }
 0x37d   :  { %980 = vmatprep.subr.bf16.mxu0 %v2041_v2  ;;  %1021 = vmatprep.subr.bf16.mxu1 %v2043_v3 }
 0x432   :  { %v734_v43 = vpop.f32.mrb[12].mxu0  ;;  %v775_v59 = vpop.f32.mrb[12].mxu1 }
 0x433   :  { %v736_v60 = vpop.f32.mrb[13].mxu0  ;;  %v777_v62 = vpop.f32.mrb[13].mxu1 }
 0x434   :  { %v786_v63 = vcombine.low %v734_v43, %v736_v60  ;;  %v787_v34 = vcombine.low %v775_v59, %v777_v62  ;;  %v738_v35 = vpop.f32.mrb[14].mxu0  ;;  %v779_v36 = vpop.f32.mrb[14].mxu1 }
 0x435   :  { %v739_v37 = vpop.f32.mrb[15].mxu0  ;;  %v780_v38 = vpop.f32.mrb[15].mxu1 }
 0x436   :  { %v794_v40 = vrot.slane %v786_v63, %v2176_v54  ;;  %v801_v41 = vrot.slane %v787_v34, %v2176_v54 }
 0x438   :  { %v802_v44 = vcombine.low %v794_v40, %v801_v41 }
 0x43a   :  { %v804_v45 = vadd.f32 %v1635_v42, %v802_v44 }
 0x43c   :  { %v805_v46 = vadd.f32 %v804_v45, %v2185_v39 }
 0x43e   :  { %v1636_v47 = vmul.f32 -1.442695, %v805_v46  ;;  %v813_v61 = vrot.slane %v805_v46, 2  ;;  %v824_v49 = vrot.slane %v805_v46, 6  ;;  %v821_v52 = vrot.slane %v805_v46, 4 }
 0x440   :  { %1817 = vpow2.f32 %v1636_v47  ;;  %v1637_v48 = vmul.f32 -1.442695, %v813_v61  ;;  %v1638_v50 = vmul.f32 -1.442695, %v824_v49 }
 0x442   :  { %1819 = vpow2.f32 %v1637_v48 }
 0x443   :  { %1821 = vpow2.f32 %v1638_v50 }
 0x44a   :  { %v1818_v51 = vpop.eup %1817 }
 0x44b   :  { %v809_v55 = vadd.f32 1.0, %v1818_v51 }
 0x44c   :  { %v1820_v56 = vpop.eup %1819 }
 0x44d   :  { %1823 = vrcp.f32 %v809_v55  ;;  %v818_v57 = vadd.f32 1.0, %v1820_v56  ;;  %v1822_v58 = vpop.eup %1821 }
 0x44e   :  { %1825 = vtanh.f32 %v821_v52  ;;  %v829_v62 = vadd.f32 1.0, %v1822_v58 }
 0x44f   :  { %1827 = vrcp.f32 %v818_v57 }
 0x450   :  { %1829 = vrcp.f32 %v829_v62  ;;  %v2373_v62 = vld [vmem:[#allocation4 + $0x24] ss:$16 sps:$4 sm:$0xff]  }
 0x457   :  { %v1824_v43 = vpop.eup %1823 }
 0x458   :  { %v1826_v59 = vpop.eup %1825 }
 0x459   :  { %v1828_v60 = vpop.eup %1827  ;;  %v833_v34 = vmul.f32 %v1826_v59, %v1824_v43  ;;  %v2367_v59 = vld [vmem:[#allocation4] ss:$16 sps:$4 sm:$0xff]  }
 0x45a   :  { %v832_v63 = vmul.f32 %v1828_v60, %v2276_v53  ;;  %v1830_v36 = vpop.eup %1829  ;;  %v2370_v60 = vld [vmem:[#allocation4 + $0x8] ss:$16 sps:$4 sm:$0xff]  }
 0x45c   :  { %v2320_v35 = vadd.f32 %v833_v34, %v832_v63  ;;  %v2376_v63 = vld [vmem:[#allocation4 + $0x2c] ss:$16 sps:$4 sm:$0xff]   ;;  %v2381_v34 = vld [vmem:[#allocation4 + $0x20] ss:$16 sps:$4 sm:$0xff]  }
 0x45e   :  { %1831 = vtanh.f32 %v2320_v35 }
 0x468   :  { %v1832_v37 = vpop.eup %1831 }
 0x469   :  { %v836_v38 = vmul.f32 %v1832_v37, %v1830_v36  ;;  %v2387_v36 = vld [vmem:[#allocation4 + $0x44] ss:$16 sps:$4 sm:$0xff]   ;;  %v2390_v37 = vld [vmem:[#allocation4 + $0x4c] ss:$16 sps:$4 sm:$0xff]  }
 0x46b   :  { %v839_v40 = vpack.c.bf16 %v836_v38, %v836_v38  ;;  %v2393_v38 = vld [vmem:[#allocation4 + $0x40] ss:$16 sps:$4 sm:$0xff]  }
 0x46d   :  { %873 = vmatmul.mubr.bf16.vlgmr.msra.gmra.mrb[16].mxu0 %v839_v40  ;;  %914 = vmatmul.mubr.bf16.vlgmr.msra.gmra.mrb[16].mxu1 %v839_v40  ;;  %v2396_v40 = vld [vmem:[#allocation4 + $0x48] ss:$16 sps:$4 sm:$0xff]  }
 0x46e   :  { %981 = vmatpush1.bf16.msra.mxu0 %v2046_v4  ;;  %1022 = vmatpush1.bf16.msra.mxu1 %v2048_v5 }
 0x46f   :  { %982 = vmatprep.subr.bf16.mxu0 %v2051_v6  ;;  %1023 = vmatprep.subr.bf16.mxu1 %v2055_v7 }
 0x470   :  { %1012 = vmatprep.mubr.bf16.mxu0 %v1980_v0  ;;  %1053 = vmatprep.mubr.bf16.mxu1 %v1980_v0 }
 0x472   :  { %983 = vmatpush1.bf16.msra.mxu0 %v2057_v8  ;;  %1024 = vmatpush1.bf16.msra.mxu1 %v2060_v9 }
 0x473   :  { %984 = vmatprep.subr.bf16.mxu0 %v2063_v10  ;;  %1025 = vmatprep.subr.bf16.mxu1 %v2065_v11 }
 0x476   :  { %985 = vmatpush1.bf16.msra.mxu0 %v2067_v12  ;;  %1026 = vmatpush1.bf16.msra.mxu1 %v2069_v13 }
 0x477   :  { %986 = vmatprep.subr.bf16.mxu0 %v2073_v14  ;;  %1027 = vmatprep.subr.bf16.mxu1 %v2077_v15 }
 0x47a   :  { %987 = vmatpush1.bf16.msra.mxu0 %v2079_v16  ;;  %1028 = vmatpush1.bf16.msra.mxu1 %v2083_v17 }
 0x47b   :  { %988 = vmatprep.subr.bf16.mxu0 %v2085_v18  ;;  %1029 = vmatprep.subr.bf16.mxu1 %v2089_v19 }
 0x47e   :  { %989 = vmatpush1.bf16.msra.mxu0 %v2091_v20  ;;  %1030 = vmatpush1.bf16.msra.mxu1 %v2093_v21 }
 0x47f   :  { %990 = vmatprep.subr.bf16.mxu0 %v2097_v22  ;;  %1031 = vmatprep.subr.bf16.mxu1 %v2101_v23 }
 0x482   :  { %991 = vmatpush1.bf16.msra.mxu0 %v2105_v24  ;;  %1032 = vmatpush1.bf16.msra.mxu1 %v2107_v25 }
 0x483   :  { %992 = vmatprep.subr.bf16.mxu0 %v2111_v26  ;;  %1033 = vmatprep.subr.bf16.mxu1 %v2113_v27 }
 0x486   :  { %993 = vmatpush1.bf16.msra.mxu0 %v2115_v28  ;;  %1034 = vmatpush1.bf16.msra.mxu1 %v2117_v29 }
 0x487   :  { %994 = vmatprep.subr.bf16.mxu0 %v2119_v30  ;;  %1035 = vmatprep.subr.bf16.mxu1 %v2121_v31 }
 0x48a   :  { %995 = vmatpush1.bf16.msra.mxu0 %v2129_v32  ;;  %1036 = vmatpush1.bf16.msra.mxu1 %v2131_v33 }
 0x48b   :  { %1120 = vmatprep.subr.bf16.mxu0 %v2041_v2  ;;  %1161 = vmatprep.subr.bf16.mxu1 %v2043_v3  ;;  %v1639_v2 = vld [vmem:[%s2538_s0 + $0x20] sm:$0xff] }
 0x540   :  { %v874_v4 = vpop.f32.mrb[16].mxu0  ;;  %v915_v5 = vpop.f32.mrb[16].mxu1 }
 0x541   :  { %v876_v6 = vpop.f32.mrb[17].mxu0  ;;  %v917_v7 = vpop.f32.mrb[17].mxu1 }
 0x542   :  { %v926_v8 = vcombine.low %v874_v4, %v876_v6  ;;  %v927_v9 = vcombine.low %v915_v5, %v917_v7  ;;  %v878_v10 = vpop.f32.mrb[18].mxu0  ;;  %v919_v11 = vpop.f32.mrb[18].mxu1  ;;  %v2399_v4 = vld [vmem:[#allocation4 + $0x64] ss:$16 sps:$4 sm:$0xff]   ;;  %v2402_v5 = vld [vmem:[#allocation4 + $0x6c] ss:$16 sps:$4 sm:$0xff]  }
 0x543   :  { %v879_v12 = vpop.f32.mrb[19].mxu0  ;;  %v920_v13 = vpop.f32.mrb[19].mxu1  ;;  %v2405_v6 = vld [vmem:[#allocation4 + $0x60] ss:$16 sps:$4 sm:$0xff]   ;;  %v2408_v7 = vld [vmem:[#allocation4 + $0x68] ss:$16 sps:$4 sm:$0xff]  }
 0x544   :  { %v934_v14 = vrot.slane %v926_v8, %v2176_v54  ;;  %v941_v15 = vrot.slane %v927_v9, %v2176_v54  ;;  %v2411_v8 = vld [vmem:[#allocation4 + $0x84] ss:$16 sps:$4 sm:$0xff]   ;;  %v2414_v9 = vld [vmem:[#allocation4 + $0x8c] ss:$16 sps:$4 sm:$0xff]   ;;  %v2417_v10 = vld [vmem:[#allocation4 + $0x80] ss:$16 sps:$4 sm:$0xff]  }
 0x545   :  { %v2420_v11 = vld [vmem:[#allocation4 + $0x88] ss:$16 sps:$4 sm:$0xff]  }
 0x546   :  { %v942_v16 = vcombine.low %v934_v14, %v941_v15 }
 0x548   :  { %v944_v3 = vadd.f32 %v1639_v2, %v942_v16 }
 0x54a   :  { %v945_v17 = vadd.f32 %v944_v3, %v2185_v39 }
 0x54c   :  { %v1640_v18 = vmul.f32 -1.442695, %v945_v17  ;;  %v953_v19 = vrot.slane %v945_v17, 2  ;;  %v964_v21 = vrot.slane %v945_v17, 6  ;;  %v961_v42 = vrot.slane %v945_v17, 4 }
 0x54e   :  { %1833 = vpow2.f32 %v1640_v18  ;;  %v1641_v20 = vmul.f32 -1.442695, %v953_v19  ;;  %v1642_v53 = vmul.f32 -1.442695, %v964_v21 }
 0x550   :  { %1835 = vpow2.f32 %v1641_v20 }
 0x551   :  { %1837 = vpow2.f32 %v1642_v53 }
 0x558   :  { %v1834_v41 = vpop.eup %1833 }
 0x559   :  { %v949_v44 = vadd.f32 1.0, %v1834_v41 }
 0x55a   :  { %v1836_v45 = vpop.eup %1835 }
 0x55b   :  { %1839 = vrcp.f32 %v949_v44  ;;  %v958_v46 = vadd.f32 1.0, %v1836_v45  ;;  %v1838_v47 = vpop.eup %1837 }
 0x55c   :  { %1841 = vtanh.f32 %v961_v42  ;;  %v969_v50 = vadd.f32 1.0, %v1838_v47 }
 0x55d   :  { %1843 = vrcp.f32 %v958_v46 }
 0x55e   :  { %1845 = vrcp.f32 %v969_v50 }
 0x565   :  { %v1840_v61 = vpop.eup %1839 }
 0x566   :  { %v1842_v48 = vpop.eup %1841 }
 0x567   :  { %v1844_v49 = vpop.eup %1843  ;;  %v973_v52 = vmul.f32 %v1842_v48, %v1840_v61 }
 0x568   :  { %v972_v51 = vmul.f32 %v1844_v49, %v2320_v35  ;;  %v1846_v56 = vpop.eup %1845  ;;  %v2384_v35 = vld [vmem:[#allocation4 + $0x28] ss:$16 sps:$4 sm:$0xff]  }
 0x56a   :  { %v2364_v55 = vadd.f32 %v973_v52, %v972_v51 }
 0x56c   :  { %1847 = vtanh.f32 %v2364_v55 }
 0x576   :  { %v1848_v57 = vpop.eup %1847 }
 0x577   :  { %v976_v58 = vmul.f32 %v1848_v57, %v1846_v56 }
 0x579   :  { %v979_v43 = vpack.c.bf16 %v976_v58, %v976_v58 }
 0x57b   :  { %1013 = vmatmul.mubr.bf16.vlgmr.msra.gmra.mrb[20].mxu0 %v979_v43  ;;  %1054 = vmatmul.mubr.bf16.vlgmr.msra.gmra.mrb[20].mxu1 %v979_v43  ;;  %v1919_v43 = vld [vmem:[#allocation4 + $0xa0] ss:$16 sps:$4 sm:$0xff]  }
 0x57c   :  { %1121 = vmatpush1.bf16.msra.mxu0 %v2367_v59  ;;  %1162 = vmatpush1.bf16.msra.mxu1 %v2370_v60 }
 0x57d   :  { %1122 = vmatprep.subr.bf16.mxu0 %v2373_v62  ;;  %1163 = vmatprep.subr.bf16.mxu1 %v2376_v63 }
 0x57e   :  { %1152 = vmatprep.mubr.bf16.mxu0 %v1980_v0  ;;  %1193 = vmatprep.mubr.bf16.mxu1 %v1980_v0 }
 0x580   :  { %1123 = vmatpush1.bf16.msra.mxu0 %v2381_v34  ;;  %1164 = vmatpush1.bf16.msra.mxu1 %v2384_v35 }
 0x581   :  { %1124 = vmatprep.subr.bf16.mxu0 %v2387_v36  ;;  %1165 = vmatprep.subr.bf16.mxu1 %v2390_v37 }
 0x584   :  { %1125 = vmatpush1.bf16.msra.mxu0 %v2393_v38  ;;  %1166 = vmatpush1.bf16.msra.mxu1 %v2396_v40 }
 0x585   :  { %1126 = vmatprep.subr.bf16.mxu0 %v2399_v4  ;;  %1167 = vmatprep.subr.bf16.mxu1 %v2402_v5 }
 0x588   :  { %1127 = vmatpush1.bf16.msra.mxu0 %v2405_v6  ;;  %1168 = vmatpush1.bf16.msra.mxu1 %v2408_v7 }
 0x589   :  { %1128 = vmatprep.subr.bf16.mxu0 %v2411_v8  ;;  %1169 = vmatprep.subr.bf16.mxu1 %v2414_v9 }
 0x58c   :  { %1129 = vmatpush1.bf16.msra.mxu0 %v2417_v10  ;;  %1170 = vmatpush1.bf16.msra.mxu1 %v2420_v11 }
 0x58d   :  { %1130 = vmatprep.subr.bf16.mxu0 %v2097_v22  ;;  %1171 = vmatprep.subr.bf16.mxu1 %v2101_v23  ;;  %v1915_v22 = vld [vmem:[#allocation4 + $0x4] ss:$16 sps:$4 sm:$0xff]   ;;  %v1916_v23 = vld [vmem:[#allocation4 + $0xc] ss:$16 sps:$4 sm:$0xff]  }
 0x590   :  { %1131 = vmatpush1.bf16.msra.mxu0 %v2105_v24  ;;  %1172 = vmatpush1.bf16.msra.mxu1 %v2107_v25 }
 0x591   :  { %1132 = vmatprep.subr.bf16.mxu0 %v2111_v26  ;;  %1173 = vmatprep.subr.bf16.mxu1 %v2113_v27 }
 0x594   :  { %1133 = vmatpush1.bf16.msra.mxu0 %v2115_v28  ;;  %1174 = vmatpush1.bf16.msra.mxu1 %v2117_v29 }
 0x595   :  { %1134 = vmatprep.subr.bf16.mxu0 %v2119_v30  ;;  %1175 = vmatprep.subr.bf16.mxu1 %v2121_v31 }
 0x598   :  { %1135 = vmatpush1.bf16.msra.mxu0 %v2129_v32  ;;  %1176 = vmatpush1.bf16.msra.mxu1 %v2131_v33  ;;  %v1643_v33 = vld [vmem:[%s2538_s0 + $0x28] sm:$0xff] }
 0x599   :  { %1260 = vmatprep.subr.bf16.mxu0 %v1915_v22  ;;  %1301 = vmatprep.subr.bf16.mxu1 %v1916_v23 }
 0x64e   :  { %v1014_v24 = vpop.f32.mrb[20].mxu0  ;;  %v1055_v25 = vpop.f32.mrb[20].mxu1 }
 0x64f   :  { %v1016_v26 = vpop.f32.mrb[21].mxu0  ;;  %v1057_v27 = vpop.f32.mrb[21].mxu1 }
 0x650   :  { %v1066_v12 = vcombine.low %v1014_v24, %v1016_v26  ;;  %v1067_v28 = vcombine.low %v1055_v25, %v1057_v27  ;;  %v1018_v13 = vpop.f32.mrb[22].mxu0  ;;  %v1059_v29 = vpop.f32.mrb[22].mxu1  ;;  %v1647_v25 = vld [vmem:[%s2538_s0 + $0x30] sm:$0xff] }
 0x651   :  { %v1019_v14 = vpop.f32.mrb[23].mxu0  ;;  %v1060_v30 = vpop.f32.mrb[23].mxu1 }
 0x652   :  { %v1074_v31 = vrot.slane %v1066_v12, %v2176_v54  ;;  %v1081_v32 = vrot.slane %v1067_v28, %v2176_v54 }
 0x654   :  { %v1082_v15 = vcombine.low %v1074_v31, %v1081_v32 }
 0x656   :  { %v1084_v2 = vadd.f32 %v1643_v33, %v1082_v15 }
 0x658   :  { %v1085_v16 = vadd.f32 %v1084_v2, %v2185_v39 }
 0x65a   :  { %v1644_v3 = vmul.f32 -1.442695, %v1085_v16  ;;  %v1093_v17 = vrot.slane %v1085_v16, 2  ;;  %v1104_v19 = vrot.slane %v1085_v16, 6  ;;  %v1101_v53 = vrot.slane %v1085_v16, 4 }
 0x65c   :  { %1849 = vpow2.f32 %v1644_v3  ;;  %v1645_v18 = vmul.f32 -1.442695, %v1093_v17  ;;  %v1646_v20 = vmul.f32 -1.442695, %v1104_v19 }
 0x65e   :  { %1851 = vpow2.f32 %v1645_v18 }
 0x65f   :  { %1853 = vpow2.f32 %v1646_v20 }
 0x666   :  { %v1850_v21 = vpop.eup %1849 }
 0x667   :  { %v1089_v41 = vadd.f32 1.0, %v1850_v21 }
 0x668   :  { %v1852_v42 = vpop.eup %1851 }
 0x669   :  { %1855 = vrcp.f32 %v1089_v41  ;;  %v1098_v44 = vadd.f32 1.0, %v1852_v42  ;;  %v1854_v45 = vpop.eup %1853 }
 0x66a   :  { %1857 = vtanh.f32 %v1101_v53  ;;  %v1109_v48 = vadd.f32 1.0, %v1854_v45 }
 0x66b   :  { %1859 = vrcp.f32 %v1098_v44 }
 0x66c   :  { %1861 = vrcp.f32 %v1109_v48  ;;  %v1763_v48 = vld [vmem:[%s2541_s3 + $0x18] sm:$0xff]  }
 0x673   :  { %v1856_v46 = vpop.eup %1855 }
 0x674   :  { %v1858_v47 = vpop.eup %1857 }
 0x675   :  { %v1860_v61 = vpop.eup %1859  ;;  %v1113_v50 = vmul.f32 %v1858_v47, %v1856_v46  ;;  %v1760_v46 = vld [vmem:[%s2541_s3] sm:$0xff]   ;;  %v1761_v47 = vld [vmem:[%s2541_s3 + $0x8] sm:$0xff]  }
 0x676   :  { %v1112_v49 = vmul.f32 %v1860_v61, %v2364_v55  ;;  %v1862_v52 = vpop.eup %1861  ;;  %v1918_v55 = vld [vmem:[#allocation4 + $0xac] ss:$16 sps:$4 sm:$0xff]  }
 0x677   :  { %v1762_v61 = vld [vmem:[%s2541_s3 + $0x10] sm:$0xff]  }
 0x678   :  { %v2442_v51 = vadd.f32 %v1113_v50, %v1112_v49  ;;  %v1764_v49 = vld [vmem:[%s2541_s3 + $0x20] sm:$0xff]   ;;  %v1765_v50 = vld [vmem:[%s2541_s3 + $0x28] sm:$0xff]  }
 0x67a   :  { %1863 = vtanh.f32 %v2442_v51 }
 0x684   :  { %v1864_v56 = vpop.eup %1863 }
 0x685   :  { %v1116_v57 = vmul.f32 %v1864_v56, %v1862_v52  ;;  %v1767_v52 = vld [vmem:[%s2541_s3 + $0x38] sm:$0xff]   ;;  %v1768_v56 = vld [vmem:[%s2543_s5] sm:$0xff]  }
 0x687   :  { %v1119_v58 = vpack.c.bf16 %v1116_v57, %v1116_v57 }
 0x689   :  { %1153 = vmatmul.mubr.bf16.vlgmr.msra.gmra.mrb[24].mxu0 %v1119_v58  ;;  %1194 = vmatmul.mubr.bf16.vlgmr.msra.gmra.mrb[24].mxu1 %v1119_v58 }
 0x68a   :  { %1261 = vmatpush1.bf16.msra.mxu0 %v2367_v59  ;;  %1302 = vmatpush1.bf16.msra.mxu1 %v2370_v60  ;;  %v1920_v59 = vld [vmem:[#allocation4 + $0xa8] ss:$16 sps:$4 sm:$0xff]   ;;  %v1921_v60 = vld [vmem:[#allocation4 + $0xc4] ss:$16 sps:$4 sm:$0xff]  }
 0x68b   :  { %1262 = vmatprep.subr.bf16.mxu0 %v2373_v62  ;;  %1303 = vmatprep.subr.bf16.mxu1 %v2376_v63  ;;  %v1922_v62 = vld [vmem:[#allocation4 + $0xcc] ss:$16 sps:$4 sm:$0xff]   ;;  %v1923_v63 = vld [vmem:[#allocation4 + $0xc0] ss:$16 sps:$4 sm:$0xff]  }
 0x68c   :  { %1292 = vmatprep.mubr.bf16.mxu0 %v1980_v0  ;;  %1333 = vmatprep.mubr.bf16.mxu1 %v1980_v0  ;;  %v1917_v0 = vld [vmem:[#allocation4 + $0xa4] ss:$16 sps:$4 sm:$0xff]  }
 0x68e   :  { %1263 = vmatpush1.bf16.msra.mxu0 %v2381_v34  ;;  %1304 = vmatpush1.bf16.msra.mxu1 %v2384_v35  ;;  %v1924_v34 = vld [vmem:[#allocation4 + $0xc8] ss:$16 sps:$4 sm:$0xff]   ;;  %v1925_v35 = vld [vmem:[#allocation4 + $0xe4] ss:$16 sps:$4 sm:$0xff]  }
 0x68f   :  { %1264 = vmatprep.subr.bf16.mxu0 %v2387_v36  ;;  %1305 = vmatprep.subr.bf16.mxu1 %v2390_v37  ;;  %v1926_v36 = vld [vmem:[#allocation4 + $0xec] ss:$16 sps:$4 sm:$0xff]   ;;  %v1927_v37 = vld [vmem:[#allocation4 + $0xe0] ss:$16 sps:$4 sm:$0xff]  }
 0x692   :  { %1265 = vmatpush1.bf16.msra.mxu0 %v2393_v38  ;;  %1306 = vmatpush1.bf16.msra.mxu1 %v2396_v40  ;;  %v1928_v38 = vld [vmem:[#allocation4 + $0xe8] ss:$16 sps:$4 sm:$0xff]  }
 0x693   :  { %1266 = vmatprep.subr.bf16.mxu0 %v2399_v4  ;;  %1307 = vmatprep.subr.bf16.mxu1 %v2402_v5 }
 0x696   :  { %1267 = vmatpush1.bf16.msra.mxu0 %v2405_v6  ;;  %1308 = vmatpush1.bf16.msra.mxu1 %v2408_v7 }
 0x697   :  { %1268 = vmatprep.subr.bf16.mxu0 %v2411_v8  ;;  %1309 = vmatprep.subr.bf16.mxu1 %v2414_v9 }
 0x69a   :  { %1269 = vmatpush1.bf16.msra.mxu0 %v2417_v10  ;;  %1310 = vmatpush1.bf16.msra.mxu1 %v2420_v11 }
 0x69b   :  { %1270 = vmatprep.subr.bf16.mxu0 %v1917_v0  ;;  %1311 = vmatprep.subr.bf16.mxu1 %v1918_v55 }
 0x69e   :  { %1271 = vmatpush1.bf16.msra.mxu0 %v1919_v43  ;;  %1312 = vmatpush1.bf16.msra.mxu1 %v1920_v59 }
 0x69f   :  { %1272 = vmatprep.subr.bf16.mxu0 %v1921_v60  ;;  %1313 = vmatprep.subr.bf16.mxu1 %v1922_v62 }
 0x6a2   :  { %1273 = vmatpush1.bf16.msra.mxu0 %v1923_v63  ;;  %1314 = vmatpush1.bf16.msra.mxu1 %v1924_v34 }
 0x6a3   :  { %1274 = vmatprep.subr.bf16.mxu0 %v1925_v35  ;;  %1315 = vmatprep.subr.bf16.mxu1 %v1926_v36  ;;  %v1651_v36 = vld [vmem:[%s2538_s0 + $0x38] sm:$0xff] }
 0x6a6   :  { %1275 = vmatpush1.bf16.msra.mxu0 %v1927_v37  ;;  %1316 = vmatpush1.bf16.msra.mxu1 %v1928_v38 }
 0x6a7   :  { %1678 = vmatprep.subr.bf16.mxu0 %v1981_v1  ;;  %1698 = vmatprep.subr.bf16.mxu1 %v1981_v1 }
 0x75c   :  { %v1154_v40 = vpop.f32.mrb[24].mxu0  ;;  %v1195_v4 = vpop.f32.mrb[24].mxu1 }
 0x75d   :  { %v1156_v5 = vpop.f32.mrb[25].mxu0  ;;  %v1197_v6 = vpop.f32.mrb[25].mxu1 }
 0x75e   :  { %v1206_v7 = vcombine.low %v1154_v40, %v1156_v5  ;;  %v1207_v8 = vcombine.low %v1195_v4, %v1197_v6  ;;  %v1158_v9 = vpop.f32.mrb[26].mxu0  ;;  %v1199_v10 = vpop.f32.mrb[26].mxu1 }
 0x75f   :  { %v1159_v11 = vpop.f32.mrb[27].mxu0  ;;  %v1200_v22 = vpop.f32.mrb[27].mxu1 }
 0x760   :  { %v1214_v23 = vrot.slane %v1206_v7, %v2176_v54  ;;  %v1221_v24 = vrot.slane %v1207_v8, %v2176_v54 }
 0x762   :  { %v1222_v26 = vcombine.low %v1214_v23, %v1221_v24 }
 0x764   :  { %v1224_v27 = vadd.f32 %v1647_v25, %v1222_v26 }
 0x766   :  { %v1225_v12 = vadd.f32 %v1224_v27, %v2185_v39 }
 0x768   :  { %v1648_v28 = vmul.f32 -1.442695, %v1225_v12  ;;  %v1233_v13 = vrot.slane %v1225_v12, 2  ;;  %v1244_v14 = vrot.slane %v1225_v12, 6  ;;  %v1241_v32 = vrot.slane %v1225_v12, 4 }
 0x76a   :  { %1865 = vpow2.f32 %v1648_v28  ;;  %v1649_v29 = vmul.f32 -1.442695, %v1233_v13  ;;  %v1650_v30 = vmul.f32 -1.442695, %v1244_v14 }
 0x76c   :  { %1867 = vpow2.f32 %v1649_v29 }
 0x76d   :  { %1869 = vpow2.f32 %v1650_v30 }
 0x774   :  { %v1866_v31 = vpop.eup %1865 }
 0x775   :  { %v1229_v33 = vadd.f32 1.0, %v1866_v31  ;;  %v1655_v31 = vld [vmem:[%s2542_s4] ss:$0 sm:$0xff]  ;;  %s1951_s4 = scalar_lea.vmem %s1584_s26, 32 }
 0x776   :  { %v1868_v15 = vpop.eup %1867  ;;  %p1952_p8 = scmp.ne.s32.totalorder %s1584_s26, %s1951_s4  ;;  %p1957_p10 = scmp.lt.s32.totalorder %s1951_s4, %s1951_s4 }
 0x777   :  { %1871 = vrcp.f32 %v1229_v33  ;;  %v1238_v2 = vadd.f32 1.0, %v1868_v15  ;;  %v1870_v16 = vpop.eup %1869 }
 0x778   :  { %1873 = vtanh.f32 %v1241_v32  ;;  %v1249_v19 = vadd.f32 1.0, %v1870_v16  ;;  %p1958_p11 = por %p1957_p10, %p1956_p9 }
 0x779   :  { %1875 = vrcp.f32 %v1238_v2 }
 0x77a   :  { %1877 = vrcp.f32 %v1249_v19  ;;  %p1959_p12 = pnand %p1958_p11, %p1952_p8 }
 0x781   :  { %v1872_v3 = vpop.eup %1871 }
 0x782   :  { %v1874_v17 = vpop.eup %1873 }
 0x783   :  { %v1876_v18 = vpop.eup %1875  ;;  %v1253_v21 = vmul.f32 %v1874_v17, %v1872_v3 }
 0x784   :  { %v1252_v20 = vmul.f32 %v1876_v18, %v2442_v51  ;;  %v1878_v41 = vpop.eup %1877  ;;  %v1766_v51 = vld [vmem:[%s2541_s3 + $0x30] sm:$0xff]   ;;  %v1664_v18 = vld [vmem:[%s2544_s6] ss:$0 sm:$0xff] }
 0x786   :  { %v2474_v53 = vadd.f32 %v1253_v21, %v1252_v20 }
 0x788   :  { %1879 = vtanh.f32 %v2474_v53 }
 0x792   :  { %v1880_v42 = vpop.eup %1879 }
 0x793   :  { %v1256_v44 = vmul.f32 %v1880_v42, %v1878_v41 }
 0x795   :  { %v1259_v45 = vpack.c.bf16 %v1256_v44, %v1256_v44 }
 0x797   :  { %1293 = vmatmul.mubr.bf16.vlgmr.msra.gmra.mrb[28].mxu0 %v1259_v45  ;;  %1334 = vmatmul.mubr.bf16.vlgmr.msra.gmra.mrb[28].mxu1 %v1259_v45 }
 0x798   :  { %1679 = vmatpush3.bf16.msra.mxu0 %v1760_v46  ;;  %1694 = vmatprep.mubr.msk.bf16.mxu0 %vm1983_vm0, %v1981_v1 }
 0x799   :  { %1680 = vmatprep.subr.bf16.mxu0 %v1981_v1  ;;  %1700 = vmatprep.mubr.msk.bf16.mxu1 %vm1983_vm0, %v1981_v1 }
 0x79a   :  { %1699 = vmatpush3.bf16.msra.mxu1 %v1768_v56 }
 0x79c   :  { %1681 = vmatpush3.bf16.msra.mxu0 %v1761_v47 }
 0x79d   :  { %1682 = vmatprep.subr.bf16.mxu0 %v1981_v1 }
 0x7a0   :  { %1683 = vmatpush3.bf16.msra.mxu0 %v1762_v61 }
 0x7a1   :  { %1684 = vmatprep.subr.bf16.mxu0 %v1981_v1 }
 0x7a4   :  { %1685 = vmatpush3.bf16.msra.mxu0 %v1763_v48 }
 0x7a5   :  { %1686 = vmatprep.subr.bf16.mxu0 %v1981_v1 }
 0x7a8   :  { %1687 = vmatpush3.bf16.msra.mxu0 %v1764_v49 }
 0x7a9   :  { %1688 = vmatprep.subr.bf16.mxu0 %v1981_v1 }
 0x7ac   :  { %1689 = vmatpush3.bf16.msra.mxu0 %v1765_v50 }
 0x7ad   :  { %1690 = vmatprep.subr.bf16.mxu0 %v1981_v1 }
 0x7b0   :  { %1691 = vmatpush3.bf16.msra.mxu0 %v1766_v51 }
 0x7b1   :  { %1692 = vmatprep.subr.bf16.mxu0 %v1981_v1 }
 0x7b4   :  { %1693 = vmatpush3.bf16.msra.mxu0 %v1767_v52 }
 0x86a   :  { %v1294_v57 = vpop.f32.mrb[28].mxu0  ;;  %v1335_v58 = vpop.f32.mrb[28].mxu1 }
 0x86b   :  { %v1296_v0 = vpop.f32.mrb[29].mxu0  ;;  %v1337_v55 = vpop.f32.mrb[29].mxu1 }
 0x86c   :  { %v1346_v43 = vcombine.low %v1294_v57, %v1296_v0  ;;  %v1347_v59 = vcombine.low %v1335_v58, %v1337_v55  ;;  %v1298_v60 = vpop.f32.mrb[30].mxu0  ;;  %v1339_v62 = vpop.f32.mrb[30].mxu1 }
 0x86d   :  { %v1299_v63 = vpop.f32.mrb[31].mxu0  ;;  %v1340_v34 = vpop.f32.mrb[31].mxu1 }
 0x86e   :  { %v1354_v35 = vrot.slane %v1346_v43, %v2176_v54  ;;  %v1361_v1 = vrot.slane %v1347_v59, %v2176_v54 }
 0x870   :  { %v1362_v37 = vcombine.low %v1354_v35, %v1361_v1 }
 0x872   :  { %v1364_v38 = vadd.f32 %v1651_v36, %v1362_v37 }
 0x874   :  { %v1365_v40 = vadd.f32 %v1364_v38, %v2185_v39 }
 0x876   :  { %v1652_v4 = vmul.f32 -1.442695, %v1365_v40  ;;  %v1373_v5 = vrot.slane %v1365_v40, 2  ;;  %v1384_v7 = vrot.slane %v1365_v40, 6  ;;  %v1381_v10 = vrot.slane %v1365_v40, 4 }
 0x878   :  { %1881 = vpow2.f32 %v1652_v4  ;;  %v1653_v6 = vmul.f32 -1.442695, %v1373_v5  ;;  %v1654_v8 = vmul.f32 -1.442695, %v1384_v7 }
 0x87a   :  { %1883 = vpow2.f32 %v1653_v6 }
 0x87b   :  { %1885 = vpow2.f32 %v1654_v8 }
 0x882   :  { %v1882_v9 = vpop.eup %1881 }
 0x883   :  { %v1369_v11 = vadd.f32 1.0, %v1882_v9 }
 0x884   :  { %v1884_v22 = vpop.eup %1883 }
 0x885   :  { %1887 = vrcp.f32 %v1369_v11  ;;  %v1378_v54 = vadd.f32 1.0, %v1884_v22  ;;  %v1886_v23 = vpop.eup %1885 }
 0x886   :  { %1889 = vtanh.f32 %v1381_v10  ;;  %v1389_v26 = vadd.f32 1.0, %v1886_v23 }
 0x887   :  { %1891 = vrcp.f32 %v1378_v54 }
 0x888   :  { %1893 = vrcp.f32 %v1389_v26 }
 0x88f   :  { %v1888_v24 = vpop.eup %1887 }
 0x890   :  { %v1890_v25 = vpop.eup %1889 }
 0x891   :  { %v1892_v39 = vpop.eup %1891  ;;  %v1393_v12 = vmul.f32 %v1890_v25, %v1888_v24 }
 0x892   :  { %v1392_v27 = vmul.f32 %v1892_v39, %v2474_v53  ;;  %v1894_v13 = vpop.eup %1893 }
 0x894   :  { %v1394_v28 = vadd.f32 %v1393_v12, %v1392_v27 }
 0x896   :  { %1895 = vtanh.f32 %v1394_v28  ;;  %1398 = vst [vmem:[#allocation3] sm:$0x3] %v1394_v28 }
 0x8a0   :  { %v1896_v29 = vpop.eup %1895 }
 0x8a1   :  { %v1396_v14 = vmul.f32 %v1896_v29, %v1894_v13 }
 0x8a3   :  { %1397 = vst [vmem:[#allocation2] sm:$0x3] %v1396_v14  ;;  %v1402_v30 = vpack.c.bf16 %v1396_v14, %v1396_v14 }
 0x8a5   :  { %1695 = vmatmul.mubr.bf16.vlgmr.msra.gmra.mrb[32].mxu0 %v1402_v30 }
 0x978   :  { %v1508_v32 = vpop.f32.mrb[32].mxu0 }
 0x979   :  { %v1509_v33 = vadd.f32 %v1655_v31, %v1508_v32  ;;  %v1696_v15 = vpop.f32.mrb[33].mxu0 }
 0x97a   :  { %v1511_v2 = vpop.f32.mrb[34].mxu0 }
 0x97b   :  { %v1514_v16 = vmax.f32 %v1509_v33, 0.0  ;;  %v1697_v3 = vpop.f32.mrb[35].mxu0 }
 0x97d   :  { %v1515_v17 = vpack.c.bf16 %v1514_v16, %v1514_v16 }
 0x97f   :  { %1701 = vmatmul.mubr.msk.bf16.vlgmr.msra.gmra.mrb[32].mxu1 %vm1531_vm1, %v1515_v17 }
 0xa52   :  { %v1569_v19 = vpop.f32.mrb[32].mxu1 }
 0xa53   :  { %v1570_v20 = vadd.f32 %v1664_v18, %v1569_v19  ;;  %v1702_v21 = vpop.f32.mrb[33].mxu1 }
 0xa54   :  { %v1572_v53 = vpop.f32.mrb[34].mxu1 }
 0xa55   :  { %v1703_v41 = vpop.f32.mrb[35].mxu1  ;;  %1576 = vst.msk [vmem:[#allocation7] sm:$0x3] %vm1575_vm2, %v1570_v20 }
 0xa56   :  { %1962 = shalt.err (!%p1959_p12)
}
 0xa57   :  { %s1963_s6 = scalar_lea.hbm %s2545_s7, 32 }
 0xa58   :  { %p1964_p13 = scmp.ne.s32.totalorder %s2545_s7, %s1963_s6  ;;  %p1967_p0 = scmp.lt.u32.totalorder %s1963_s6, %s2545_s7 }
 0xa5a   :  { %p1969_p1 = pnand %p1967_p0, %p1964_p13 }
 0xa5c   :  { %1972 = shalt.err (!%p1969_p1)
}
 0xa5d   :  { %1586 = dma.vmem_to_hbm [thread:$0]  %s1584_s26, 32, %s2545_s7, [#allocation6]  }
 0xa5e   :  { %1975 = dma.done.wait [#allocation6], 32  }
 0xa5f   :  { %1976 = vsyncadd [#allocation6], 4294967264 }
 0xa60   :  { %1590 = vsyncpa [#allocation5], 1 }
 0xa61   :  { %1591 = vsyncpa [#allocation6], 1 }

</bundles_post_ra>
